<compile_context>
chip_gen: v7x
topology: tpu7x:2x2x1
jax: 0.10.0
libtpu: 0.0.40
codegen_flags: <defaults>
</compile_context>

<pallas_src>
import math
from functools import partial

import jax
import jax.numpy as jnp
from jax.experimental import pallas as pl
from jax.experimental.pallas import tpu as pltpu


# ----------------------------------------------------------------------------
# Fused kernel: one (batch block, layer) step of the encoder stack.
# ----------------------------------------------------------------------------
def encoder_fused_kernel(x_ref,
                         wqkv_ref, bqkv_ref,
                         wo_ref, bo_ref,
                         g1_ref, be1_ref,
                         w1_ref, b1_ref,
                         w2_ref, b2_ref,
                         g2_ref, be2_ref,
                         out_ref,
                         ctx_ref,
                         *, n_head, d_feature):
    layer = pl.program_id(1)
    Bb, S, D = out_ref.shape
    dh = n_head * d_feature
    M = Bb * S

    # First layer: load this batch block's activations into the resident
    # output block.  It stays in VMEM across all layer iterations.
    @pl.when(layer == 0)
    def _():
        out_ref[...] = x_ref[...]

    # Residual stream for this block, flattened to (Bb*S, D) for the matmuls.
    x = out_ref[...].astype(jnp.float32).reshape(M, D)

    def matmul_bias(a_f32, w_ref, b_ref):
        # bf16 MXU operands, f32 accumulation, f32 bias add.
        return jnp.dot(a_f32.astype(jnp.bfloat16), w_ref[0],
                       preferred_element_type=jnp.float32) + b_ref[0]

    # ---- fused Q/K/V projection: one wide matmul on (Bb*S, D) -------------
    qkv = matmul_bias(x, wqkv_ref, bqkv_ref)                 # (M, 3*dh) f32
    qkv_b = qkv.astype(jnp.bfloat16).reshape(Bb, S, 3 * dh)

    # ---- per-head attention, batched over Bb; contexts -> VMEM scratch ----
    for h in range(n_head):
        lo = h * d_feature
        qh = qkv_b[:, :, lo:lo + d_feature]                           # (Bb,S,dF)
        kh = qkv_b[:, :, dh + lo:dh + lo + d_feature]                 # (Bb,S,dF)
        vh = qkv_b[:, :, 2 * dh + lo:2 * dh + lo + d_feature]         # (Bb,S,dF)
        # 1/sqrt(dF) already folded into the Q weights/bias.  Contraction on
        # the last dims of both operands -> no explicit K transpose.
        s = jnp.einsum('bqd,bkd->bqk', qh, kh,
                       preferred_element_type=jnp.float32)            # (Bb,S,S)
        s = s - jnp.max(s, axis=-1, keepdims=True)
        p = jnp.exp(s)
        p = p / jnp.sum(p, axis=-1, keepdims=True)                    # exact
        ctx_h = jnp.einsum('bqk,bkd->bqd', p.astype(jnp.bfloat16), vh,
                           preferred_element_type=jnp.float32)        # (Bb,S,dF)
        ctx_ref[:, lo:lo + d_feature] = (
            ctx_h.reshape(M, d_feature).astype(jnp.bfloat16))

    attn = jnp.dot(ctx_ref[...], wo_ref[0],
                   preferred_element_type=jnp.float32) + bo_ref[0]    # (M, D)

    def layer_norm(v, g_ref, b_ref, eps=1e-5):
        mu = jnp.mean(v, axis=-1, keepdims=True)
        var = jnp.mean((v - mu) ** 2, axis=-1, keepdims=True)
        return (v - mu) * jax.lax.rsqrt(var + eps) * g_ref[0] + b_ref[0]

    y = layer_norm(x + attn, g1_ref, be1_ref)                         # (M, D)

    hid = jnp.maximum(matmul_bias(y, w1_ref, b1_ref), 0.0)            # (M, d_fc)
    ffn = matmul_bias(hid, w2_ref, b2_ref)                            # (M, D)

    out_ref[...] = (layer_norm(y + ffn, g2_ref, be2_ref)
                    .reshape(Bb, S, D).astype(out_ref.dtype))


# ----------------------------------------------------------------------------
# Wrapper: single pallas_call over grid = (B // Bb, layer).
# ----------------------------------------------------------------------------
def encoder_forward(x, stacked_params, n_head, d_feature, batch_block=None):
    B, S, D = x.shape
    n_blocks = stacked_params[0].shape[0]
    dh = n_head * d_feature
    d_fc = stacked_params[6].shape[-1]

    if batch_block is None:
        # Pack as many batch rows as possible per grid step while keeping >= 2
        # batch blocks so the 'parallel' axis still shards over v7x's 2 TCs.
        batch_block = max(1, B // 2)
    Bb = batch_block
    assert B % Bb == 0, "batch must be divisible by the batch block size"

    def wspec(arr):
        return pl.BlockSpec((1,) + arr.shape[1:], lambda b, l: (l, 0, 0))

    in_specs = [pl.BlockSpec((Bb, S, D), lambda b, l: (b, 0, 0))]
    in_specs += [wspec(p) for p in stacked_params]

    kernel = partial(encoder_fused_kernel, n_head=n_head, d_feature=d_feature)

    # ---- VMEM sizing: request what is needed (+headroom), never the whole
    # ---- 64 MiB physical VMEM of a v7x TensorCore. -------------------------
    per_layer_w_bytes = sum(int(p.size // n_blocks) * p.dtype.itemsize
                            for p in stacked_params)
    act_block_bytes = Bb * S * D * x.dtype.itemsize
    ctx_bytes = Bb * S * dh * 2  # bf16 scratch
    need = 2 * per_layer_w_bytes + 4 * act_block_bytes + ctx_bytes
    vmem_limit = int(min(max(3 * need, 8 * 1024 * 1024), 48 * 1024 * 1024))

    # ---- advisory cost estimate for XLA scheduling around the fused stack --
    flops_per_tok_layer = (2 * D * 3 * dh          # fused QKV projection
                           + 2 * 2 * S * dh        # scores + context
                           + 2 * dh * D            # output projection
                           + 2 * 2 * D * d_fc)     # FFN (two matmuls)
    cost = pl.CostEstimate(
        flops=int(B * S * n_blocks * flops_per_tok_layer),
        transcendentals=int(B * n_blocks * n_head * S * S),
        bytes_accessed=int(2 * x.size * x.dtype.itemsize
                           + (B // Bb) * sum(p.size * p.dtype.itemsize
                                             for p in stacked_params)))

    return pl.pallas_call(
        kernel,
        out_shape=jax.ShapeDtypeStruct((B, S, D), x.dtype),
        grid=(B // Bb, n_blocks),
        in_specs=in_specs,
        out_specs=pl.BlockSpec((Bb, S, D), lambda b, l: (b, 0, 0)),
        scratch_shapes=[pltpu.VMEM((Bb * S, dh), jnp.bfloat16)],
        compiler_params=pltpu.CompilerParams(
            dimension_semantics=("parallel", "arbitrary"),
            vmem_limit_bytes=vmem_limit),
        cost_estimate=cost,
    )(x, *stacked_params)


# ----------------------------------------------------------------------------
# Parameter construction (PyTorch-Linear-style uniform init) and preparation
# (QKV fusion, scale folding, bf16 weights, layer stacking).
# ----------------------------------------------------------------------------
def make_block_params(key, d_model, d_feature, n_head, d_fc):
    dh = n_head * d_feature
    ks = jax.random.split(key, 6)

    def lin(k, fan_in, fan_out):
        bound = 1.0 / math.sqrt(fan_in)
        kw, kb = jax.random.split(k)
        w = jax.random.uniform(kw, (fan_in, fan_out), jnp.float32, -bound, bound)
        b = jax.random.uniform(kb, (1, fan_out), jnp.float32, -bound, bound)
        return w, b

    wq, bq = lin(ks[0], d_model, dh)
    wk, bk = lin(ks[1], d_model, dh)
    wv, bv = lin(ks[2], d_model, dh)
    wo, bo = lin(ks[3], dh, d_model)
    w1, b1 = lin(ks[4], d_model, d_fc)
    w2, b2 = lin(ks[5], d_fc, d_model)
    ones = jnp.ones((1, d_model), jnp.float32)
    zeros = jnp.zeros((1, d_model), jnp.float32)
    return dict(wq=wq, bq=bq, wk=wk, bk=bk, wv=wv, bv=bv, wo=wo, bo=bo,
                g1=ones, be1=zeros, w1=w1, b1=b1, w2=w2, b2=b2,
                g2=ones, be2=zeros)


def prepare_stacked_params(blocks, d_feature):
    """Fuse Q/K/V into one weight, fold 1/sqrt(dF) into Q, cast matmul weights
    to bf16, and stack all layers along a leading axis."""
    scale = 1.0 / math.sqrt(d_feature)

    def one(p):
        w_qkv = jnp.concatenate([p["wq"] * scale, p["wk"], p["wv"]], axis=1)
        b_qkv = jnp.concatenate([p["bq"] * scale, p["bk"], p["bv"]], axis=1)
        return (w_qkv.astype(jnp.bfloat16), b_qkv,
                p["wo"].astype(jnp.bfloat16), p["bo"],
                p["g1"], p["be1"],
                p["w1"].astype(jnp.bfloat16), p["b1"],
                p["w2"].astype(jnp.bfloat16), p["b2"],
                p["g2"], p["be2"])

    per_layer = [one(p) for p in blocks]
    n = len(per_layer[0])
    return tuple(jnp.stack([layer[i] for layer in per_layer], axis=0)
                 for i in range(n))


if __name__ == "__main__":
    # Small, lane-friendly shapes consistent with the module's (B, S, d_model)
    # forward: d_model multiple of 128 (lane-dense output), d_feature = 128
    # (lane-aligned per-head slices), B chosen so the batch splits into 2
    # blocks of Bb=2 rows (megacore-friendly while amortizing weight DMA).
    B, S = 4, 16
    d_model, d_feature, n_head, d_fc, n_blocks = 128, 128, 2, 256, 2

    root = jax.random.PRNGKey(0)
    kx, kp = jax.random.split(root)
    x = jax.random.normal(kx, (B, S, d_model), dtype=jnp.float32)

    block_keys = jax.random.split(kp, n_blocks)
    blocks = [make_block_params(block_keys[i], d_model, d_feature, n_head, d_fc)
              for i in range(n_blocks)]
    stacked = prepare_stacked_params(blocks, d_feature)

    out = encoder_forward(x, stacked, n_head, d_feature)
    out = jax.block_until_ready(out)
    assert out.shape == (B, S, d_model)
    print("KERNEL_OK")
</pallas_src>

<mosaic_0001>
module attributes {stable_mosaic.version = 11 : i64} {
  func.func @encoder_fused_kernel(%arg0: i32, %arg1: i32, %arg2: memref<2x16x128xf32, #tpu.memory_space<vmem>>, %arg3: memref<1x128x768xbf16, #tpu.memory_space<vmem>>, %arg4: memref<1x1x768xf32, #tpu.memory_space<vmem>>, %arg5: memref<1x256x128xbf16, #tpu.memory_space<vmem>>, %arg6: memref<1x1x128xf32, #tpu.memory_space<vmem>>, %arg7: memref<1x1x128xf32, #tpu.memory_space<vmem>>, %arg8: memref<1x1x128xf32, #tpu.memory_space<vmem>>, %arg9: memref<1x128x256xbf16, #tpu.memory_space<vmem>>, %arg10: memref<1x1x256xf32, #tpu.memory_space<vmem>>, %arg11: memref<1x256x128xbf16, #tpu.memory_space<vmem>>, %arg12: memref<1x1x128xf32, #tpu.memory_space<vmem>>, %arg13: memref<1x1x128xf32, #tpu.memory_space<vmem>>, %arg14: memref<1x1x128xf32, #tpu.memory_space<vmem>>, %arg15: memref<2x16x128xf32, #tpu.memory_space<vmem>>, %arg16: memref<32x256xbf16, #tpu.memory_space<vmem>>) attributes {dimension_semantics = [#tpu.dimension_semantics<parallel>, #tpu.dimension_semantics<arbitrary>], iteration_bounds = array<i64: 2, 2>, scalar_prefetch = 0 : i64, scratch_operands = 1 : i64, tpu.core_type = #tpu.core_type<tc>, window_params = [{transform_indices = @transform_0, window_bounds = array<i64: 2, 16, 128>}, {transform_indices = @transform_1, window_bounds = array<i64: 1, 128, 768>}, {transform_indices = @transform_2, window_bounds = array<i64: 1, 1, 768>}, {transform_indices = @transform_3, window_bounds = array<i64: 1, 256, 128>}, {transform_indices = @transform_4, window_bounds = array<i64: 1, 1, 128>}, {transform_indices = @transform_5, window_bounds = array<i64: 1, 1, 128>}, {transform_indices = @transform_6, window_bounds = array<i64: 1, 1, 128>}, {transform_indices = @transform_7, window_bounds = array<i64: 1, 128, 256>}, {transform_indices = @transform_8, window_bounds = array<i64: 1, 1, 256>}, {transform_indices = @transform_9, window_bounds = array<i64: 1, 256, 128>}, {transform_indices = @transform_10, window_bounds = array<i64: 1, 1, 128>}, {transform_indices = @transform_11, window_bounds = array<i64: 1, 1, 128>}, {transform_indices = @transform_12, window_bounds = array<i64: 1, 1, 128>}, {transform_indices = @transform_13, window_bounds = array<i64: 2, 16, 128>}]} {
    %c0_i32 = arith.constant 0 : i32
    %0 = arith.cmpi eq, %arg1, %c0_i32 : i32
    %1 = arith.extui %0 : i1 to i32
    %c0_i32_0 = arith.constant 0 : i32
    %2 = arith.cmpi ne, %1, %c0_i32_0 : i32
    scf.if %2 {
      %c0_69 = arith.constant 0 : index
      %c0_70 = arith.constant 0 : index
      %c0_71 = arith.constant 0 : index
      %133 = vector.load %arg2[%c0_69, %c0_70, %c0_71] : memref<2x16x128xf32, #tpu.memory_space<vmem>>, vector<2x16x128xf32>
      %c0_72 = arith.constant 0 : index
      %c0_73 = arith.constant 0 : index
      %c0_74 = arith.constant 0 : index
      %134 = vector.load %arg15[%c0_72, %c0_73, %c0_74] : memref<2x16x128xf32, #tpu.memory_space<vmem>>, vector<2x16x128xf32>
      tpu.vector_store %arg15[%c0_72, %c0_73, %c0_74], %133 {strides = array<i32>} : memref<2x16x128xf32, #tpu.memory_space<vmem>>, vector<2x16x128xf32>,
    } else {
    }
    %c0 = arith.constant 0 : index
    %c0_1 = arith.constant 0 : index
    %c0_2 = arith.constant 0 : index
    %3 = vector.load %arg15[%c0, %c0_1, %c0_2] : memref<2x16x128xf32, #tpu.memory_space<vmem>>, vector<2x16x128xf32>
    %4 = vector.shape_cast %3 : vector<2x16x128xf32> to vector<32x128xf32>
    %5 = arith.truncf %4 : vector<32x128xf32> to vector<32x128xbf16>
    %c0_3 = arith.constant 0 : index
    %c0_4 = arith.constant 0 : index
    %c0_5 = arith.constant 0 : index
    %6 = vector.load %arg3[%c0_3, %c0_4, %c0_5] : memref<1x128x768xbf16, #tpu.memory_space<vmem>>, vector<1x128x768xbf16>
    %7 = vector.shape_cast %6 : vector<1x128x768xbf16> to vector<128x768xbf16>
    %cst = arith.constant dense<0.000000e+00> : vector<32x768xf32>
    %8 = tpu.matmul %5, %7, %cst {dimension_numbers = #tpu.dot_dimension_numbers<[1], [0], [0], [1], [0, 0, 1, 1], [], []>} : vector<32x128xbf16>, vector<128x768xbf16>, vector<32x768xf32> -> vector<32x768xf32>
    %c0_6 = arith.constant 0 : index
    %c0_7 = arith.constant 0 : index
    %c0_8 = arith.constant 0 : index
    %9 = vector.load %arg4[%c0_6, %c0_7, %c0_8] : memref<1x1x768xf32, #tpu.memory_space<vmem>>, vector<1x1x768xf32>
    %10 = vector.shape_cast %9 : vector<1x1x768xf32> to vector<1x768xf32>
    %11 = vector.broadcast %10 : vector<1x768xf32> to vector<32x768xf32>
    %12 = arith.addf %8, %11 : vector<32x768xf32>
    %13 = arith.truncf %12 : vector<32x768xf32> to vector<32x768xbf16>
    %14 = vector.shape_cast %13 : vector<32x768xbf16> to vector<2x16x768xbf16>
    %15 = vector.extract_strided_slice %14 {offsets = [0, 0, 0], sizes = [2, 16, 128], strides = [1, 1, 1]} : vector<2x16x768xbf16> to vector<2x16x128xbf16>
    %16 = vector.extract_strided_slice %14 {offsets = [0, 0, 256], sizes = [2, 16, 128], strides = [1, 1, 1]} : vector<2x16x768xbf16> to vector<2x16x128xbf16>
    %17 = vector.extract_strided_slice %14 {offsets = [0, 0, 512], sizes = [2, 16, 128], strides = [1, 1, 1]} : vector<2x16x768xbf16> to vector<2x16x128xbf16>
    "tpu.trace_start"() <{level = 10 : i32, message = "bqd,bkd->bqk"}> : () -> ()
    %cst_9 = arith.constant dense<0.000000e+00> : vector<2x16x16xf32>
    %18 = tpu.matmul %15, %16, %cst_9 {dimension_numbers = #tpu.dot_dimension_numbers<[2], [2], [1], [1], [0, 0, 0, 1, 1, 1], [0], [0]>} : vector<2x16x128xbf16>, vector<2x16x128xbf16>, vector<2x16x16xf32> -> vector<2x16x16xf32>
    "tpu.trace_stop"() : () -> ()
    %cst_10 = arith.constant dense<0xFF800000> : vector<2x16xf32>
    %19 = vector.multi_reduction <maximumf>, %18, %cst_10 [2] : vector<2x16x16xf32> to vector<2x16xf32>
    %20 = vector.shape_cast %19 : vector<2x16xf32> to vector<2x16x1xf32>
    %21 = vector.broadcast %20 : vector<2x16x1xf32> to vector<2x16x16xf32>
    %22 = arith.subf %18, %21 : vector<2x16x16xf32>
    %23 = math.exp %22 : vector<2x16x16xf32>
    %cst_11 = arith.constant dense<0.000000e+00> : vector<2x16xf32>
    %24 = vector.multi_reduction <add>, %23, %cst_11 [2] : vector<2x16x16xf32> to vector<2x16xf32>
    %25 = vector.shape_cast %24 : vector<2x16xf32> to vector<2x16x1xf32>
    %26 = vector.broadcast %25 : vector<2x16x1xf32> to vector<2x16x16xf32>
    %27 = arith.divf %23, %26 : vector<2x16x16xf32>
    %28 = arith.truncf %27 : vector<2x16x16xf32> to vector<2x16x16xbf16>
    "tpu.trace_start"() <{level = 10 : i32, message = "bqk,bkd->bqd"}> : () -> ()
    %cst_12 = arith.constant dense<0.000000e+00> : vector<2x16x128xf32>
    %29 = tpu.matmul %28, %17, %cst_12 {dimension_numbers = #tpu.dot_dimension_numbers<[2], [1], [1], [2], [0, 0, 0, 1, 1, 2], [0], [0]>} : vector<2x16x16xbf16>, vector<2x16x128xbf16>, vector<2x16x128xf32> -> vector<2x16x128xf32>
    "tpu.trace_stop"() : () -> ()
    %30 = vector.shape_cast %29 : vector<2x16x128xf32> to vector<32x128xf32>
    %31 = arith.truncf %30 : vector<32x128xf32> to vector<32x128xbf16>
    %c0_13 = arith.constant 0 : index
    %c0_14 = arith.constant 0 : index
    %32 = vector.load %arg16[%c0_13, %c0_14] : memref<32x256xbf16, #tpu.memory_space<vmem>>, vector<32x128xbf16>
    tpu.vector_store %arg16[%c0_13, %c0_14], %31 {strides = array<i32>} : memref<32x256xbf16, #tpu.memory_space<vmem>>, vector<32x128xbf16>,
    %33 = vector.extract_strided_slice %14 {offsets = [0, 0, 128], sizes = [2, 16, 128], strides = [1, 1, 1]} : vector<2x16x768xbf16> to vector<2x16x128xbf16>
    %34 = vector.extract_strided_slice %14 {offsets = [0, 0, 384], sizes = [2, 16, 128], strides = [1, 1, 1]} : vector<2x16x768xbf16> to vector<2x16x128xbf16>
    %35 = vector.extract_strided_slice %14 {offsets = [0, 0, 640], sizes = [2, 16, 128], strides = [1, 1, 1]} : vector<2x16x768xbf16> to vector<2x16x128xbf16>
    "tpu.trace_start"() <{level = 10 : i32, message = "bqd,bkd->bqk"}> : () -> ()
    %cst_15 = arith.constant dense<0.000000e+00> : vector<2x16x16xf32>
    %36 = tpu.matmul %33, %34, %cst_15 {dimension_numbers = #tpu.dot_dimension_numbers<[2], [2], [1], [1], [0, 0, 0, 1, 1, 1], [0], [0]>} : vector<2x16x128xbf16>, vector<2x16x128xbf16>, vector<2x16x16xf32> -> vector<2x16x16xf32>
    "tpu.trace_stop"() : () -> ()
    %cst_16 = arith.constant dense<0xFF800000> : vector<2x16xf32>
    %37 = vector.multi_reduction <maximumf>, %36, %cst_16 [2] : vector<2x16x16xf32> to vector<2x16xf32>
    %38 = vector.shape_cast %37 : vector<2x16xf32> to vector<2x16x1xf32>
    %39 = vector.broadcast %38 : vector<2x16x1xf32> to vector<2x16x16xf32>
    %40 = arith.subf %36, %39 : vector<2x16x16xf32>
    %41 = math.exp %40 : vector<2x16x16xf32>
    %cst_17 = arith.constant dense<0.000000e+00> : vector<2x16xf32>
    %42 = vector.multi_reduction <add>, %41, %cst_17 [2] : vector<2x16x16xf32> to vector<2x16xf32>
    %43 = vector.shape_cast %42 : vector<2x16xf32> to vector<2x16x1xf32>
    %44 = vector.broadcast %43 : vector<2x16x1xf32> to vector<2x16x16xf32>
    %45 = arith.divf %41, %44 : vector<2x16x16xf32>
    %46 = arith.truncf %45 : vector<2x16x16xf32> to vector<2x16x16xbf16>
    "tpu.trace_start"() <{level = 10 : i32, message = "bqk,bkd->bqd"}> : () -> ()
    %cst_18 = arith.constant dense<0.000000e+00> : vector<2x16x128xf32>
    %47 = tpu.matmul %46, %35, %cst_18 {dimension_numbers = #tpu.dot_dimension_numbers<[2], [1], [1], [2], [0, 0, 0, 1, 1, 2], [0], [0]>} : vector<2x16x16xbf16>, vector<2x16x128xbf16>, vector<2x16x128xf32> -> vector<2x16x128xf32>
    "tpu.trace_stop"() : () -> ()
    %48 = vector.shape_cast %47 : vector<2x16x128xf32> to vector<32x128xf32>
    %49 = arith.truncf %48 : vector<32x128xf32> to vector<32x128xbf16>
    %c0_19 = arith.constant 0 : index
    %c128 = arith.constant 128 : index
    %50 = vector.load %arg16[%c0_19, %c128] : memref<32x256xbf16, #tpu.memory_space<vmem>>, vector<32x128xbf16>
    tpu.vector_store %arg16[%c0_19, %c128], %49 {strides = array<i32>} : memref<32x256xbf16, #tpu.memory_space<vmem>>, vector<32x128xbf16>,
    %c0_20 = arith.constant 0 : index
    %c0_21 = arith.constant 0 : index
    %51 = vector.load %arg16[%c0_20, %c0_21] : memref<32x256xbf16, #tpu.memory_space<vmem>>, vector<32x256xbf16>
    %c0_22 = arith.constant 0 : index
    %c0_23 = arith.constant 0 : index
    %c0_24 = arith.constant 0 : index
    %52 = vector.load %arg5[%c0_22, %c0_23, %c0_24] : memref<1x256x128xbf16, #tpu.memory_space<vmem>>, vector<1x256x128xbf16>
    %53 = vector.shape_cast %52 : vector<1x256x128xbf16> to vector<256x128xbf16>
    %cst_25 = arith.constant dense<0.000000e+00> : vector<32x128xf32>
    %54 = tpu.matmul %51, %53, %cst_25 {dimension_numbers = #tpu.dot_dimension_numbers<[1], [0], [0], [1], [0, 0, 1, 1], [], []>} : vector<32x256xbf16>, vector<256x128xbf16>, vector<32x128xf32> -> vector<32x128xf32>
    %c0_26 = arith.constant 0 : index
    %c0_27 = arith.constant 0 : index
    %c0_28 = arith.constant 0 : index
    %55 = vector.load %arg6[%c0_26, %c0_27, %c0_28] : memref<1x1x128xf32, #tpu.memory_space<vmem>>, vector<1x1x128xf32>
    %56 = vector.shape_cast %55 : vector<1x1x128xf32> to vector<1x128xf32>
    %57 = vector.broadcast %56 : vector<1x128xf32> to vector<32x128xf32>
    %58 = arith.addf %54, %57 : vector<32x128xf32>
    %59 = arith.addf %4, %58 : vector<32x128xf32>
    %cst_29 = arith.constant dense<0.000000e+00> : vector<32xf32>
    %60 = vector.multi_reduction <add>, %59, %cst_29 [1] : vector<32x128xf32> to vector<32xf32>
    %61 = vector.shape_cast %60 : vector<32xf32> to vector<32x1xf32>
    %cst_30 = arith.constant 1.280000e+02 : f32
    %62 = vector.broadcast %cst_30 : f32 to vector<32x1xf32>
    %63 = arith.divf %61, %62 : vector<32x1xf32>
    %64 = vector.broadcast %63 : vector<32x1xf32> to vector<32x128xf32>
    %65 = arith.subf %59, %64 : vector<32x128xf32>
    %66 = arith.mulf %65, %65 : vector<32x128xf32>
    %cst_31 = arith.constant dense<0.000000e+00> : vector<32xf32>
    %67 = vector.multi_reduction <add>, %66, %cst_31 [1] : vector<32x128xf32> to vector<32xf32>
    %68 = vector.shape_cast %67 : vector<32xf32> to vector<32x1xf32>
    %cst_32 = arith.constant 1.280000e+02 : f32
    %69 = vector.broadcast %cst_32 : f32 to vector<32x1xf32>
    %70 = arith.divf %68, %69 : vector<32x1xf32>
    %71 = vector.broadcast %63 : vector<32x1xf32> to vector<32x128xf32>
    %72 = arith.subf %59, %71 : vector<32x128xf32>
    %cst_33 = arith.constant 9.99999974E-6 : f32
    %73 = vector.broadcast %cst_33 : f32 to vector<32x1xf32>
    %74 = arith.addf %70, %73 : vector<32x1xf32>
    %75 = math.rsqrt %74 : vector<32x1xf32>
    %76 = vector.broadcast %75 : vector<32x1xf32> to vector<32x128xf32>
    %77 = arith.mulf %72, %76 : vector<32x128xf32>
    %c0_34 = arith.constant 0 : index
    %c0_35 = arith.constant 0 : index
    %c0_36 = arith.constant 0 : index
    %78 = vector.load %arg7[%c0_34, %c0_35, %c0_36] : memref<1x1x128xf32, #tpu.memory_space<vmem>>, vector<1x1x128xf32>
    %79 = vector.shape_cast %78 : vector<1x1x128xf32> to vector<1x128xf32>
    %80 = vector.broadcast %79 : vector<1x128xf32> to vector<32x128xf32>
    %81 = arith.mulf %77, %80 : vector<32x128xf32>
    %c0_37 = arith.constant 0 : index
    %c0_38 = arith.constant 0 : index
    %c0_39 = arith.constant 0 : index
    %82 = vector.load %arg8[%c0_37, %c0_38, %c0_39] : memref<1x1x128xf32, #tpu.memory_space<vmem>>, vector<1x1x128xf32>
    %83 = vector.shape_cast %82 : vector<1x1x128xf32> to vector<1x128xf32>
    %84 = vector.broadcast %83 : vector<1x128xf32> to vector<32x128xf32>
    %85 = arith.addf %81, %84 : vector<32x128xf32>
    %86 = arith.truncf %85 : vector<32x128xf32> to vector<32x128xbf16>
    %c0_40 = arith.constant 0 : index
    %c0_41 = arith.constant 0 : index
    %c0_42 = arith.constant 0 : index
    %87 = vector.load %arg9[%c0_40, %c0_41, %c0_42] : memref<1x128x256xbf16, #tpu.memory_space<vmem>>, vector<1x128x256xbf16>
    %88 = vector.shape_cast %87 : vector<1x128x256xbf16> to vector<128x256xbf16>
    %cst_43 = arith.constant dense<0.000000e+00> : vector<32x256xf32>
    %89 = tpu.matmul %86, %88, %cst_43 {dimension_numbers = #tpu.dot_dimension_numbers<[1], [0], [0], [1], [0, 0, 1, 1], [], []>} : vector<32x128xbf16>, vector<128x256xbf16>, vector<32x256xf32> -> vector<32x256xf32>
    %c0_44 = arith.constant 0 : index
    %c0_45 = arith.constant 0 : index
    %c0_46 = arith.constant 0 : index
    %90 = vector.load %arg10[%c0_44, %c0_45, %c0_46] : memref<1x1x256xf32, #tpu.memory_space<vmem>>, vector<1x1x256xf32>
    %91 = vector.shape_cast %90 : vector<1x1x256xf32> to vector<1x256xf32>
    %92 = vector.broadcast %91 : vector<1x256xf32> to vector<32x256xf32>
    %93 = arith.addf %89, %92 : vector<32x256xf32>
    %cst_47 = arith.constant 0.000000e+00 : f32
    %94 = vector.broadcast %cst_47 : f32 to vector<32x256xf32>
    %95 = arith.maximumf %93, %94 : vector<32x256xf32>
    %96 = arith.truncf %95 : vector<32x256xf32> to vector<32x256xbf16>
    %c0_48 = arith.constant 0 : index
    %c0_49 = arith.constant 0 : index
    %c0_50 = arith.constant 0 : index
    %97 = vector.load %arg11[%c0_48, %c0_49, %c0_50] : memref<1x256x128xbf16, #tpu.memory_space<vmem>>, vector<1x256x128xbf16>
    %98 = vector.shape_cast %97 : vector<1x256x128xbf16> to vector<256x128xbf16>
    %cst_51 = arith.constant dense<0.000000e+00> : vector<32x128xf32>
    %99 = tpu.matmul %96, %98, %cst_51 {dimension_numbers = #tpu.dot_dimension_numbers<[1], [0], [0], [1], [0, 0, 1, 1], [], []>} : vector<32x256xbf16>, vector<256x128xbf16>, vector<32x128xf32> -> vector<32x128xf32>
    %c0_52 = arith.constant 0 : index
    %c0_53 = arith.constant 0 : index
    %c0_54 = arith.constant 0 : index
    %100 = vector.load %arg12[%c0_52, %c0_53, %c0_54] : memref<1x1x128xf32, #tpu.memory_space<vmem>>, vector<1x1x128xf32>
    %101 = vector.shape_cast %100 : vector<1x1x128xf32> to vector<1x128xf32>
    %102 = vector.broadcast %101 : vector<1x128xf32> to vector<32x128xf32>
    %103 = arith.addf %99, %102 : vector<32x128xf32>
    %104 = arith.addf %85, %103 : vector<32x128xf32>
    %cst_55 = arith.constant dense<0.000000e+00> : vector<32xf32>
    %105 = vector.multi_reduction <add>, %104, %cst_55 [1] : vector<32x128xf32> to vector<32xf32>
    %106 = vector.shape_cast %105 : vector<32xf32> to vector<32x1xf32>
    %cst_56 = arith.constant 1.280000e+02 : f32
    %107 = vector.broadcast %cst_56 : f32 to vector<32x1xf32>
    %108 = arith.divf %106, %107 : vector<32x1xf32>
    %109 = vector.broadcast %108 : vector<32x1xf32> to vector<32x128xf32>
    %110 = arith.subf %104, %109 : vector<32x128xf32>
    %111 = arith.mulf %110, %110 : vector<32x128xf32>
    %cst_57 = arith.constant dense<0.000000e+00> : vector<32xf32>
    %112 = vector.multi_reduction <add>, %111, %cst_57 [1] : vector<32x128xf32> to vector<32xf32>
    %113 = vector.shape_cast %112 : vector<32xf32> to vector<32x1xf32>
    %cst_58 = arith.constant 1.280000e+02 : f32
    %114 = vector.broadcast %cst_58 : f32 to vector<32x1xf32>
    %115 = arith.divf %113, %114 : vector<32x1xf32>
    %116 = vector.broadcast %108 : vector<32x1xf32> to vector<32x128xf32>
    %117 = arith.subf %104, %116 : vector<32x128xf32>
    %cst_59 = arith.constant 9.99999974E-6 : f32
    %118 = vector.broadcast %cst_59 : f32 to vector<32x1xf32>
    %119 = arith.addf %115, %118 : vector<32x1xf32>
    %120 = math.rsqrt %119 : vector<32x1xf32>
    %121 = vector.broadcast %120 : vector<32x1xf32> to vector<32x128xf32>
    %122 = arith.mulf %117, %121 : vector<32x128xf32>
    %c0_60 = arith.constant 0 : index
    %c0_61 = arith.constant 0 : index
    %c0_62 = arith.constant 0 : index
    %123 = vector.load %arg13[%c0_60, %c0_61, %c0_62] : memref<1x1x128xf32, #tpu.memory_space<vmem>>, vector<1x1x128xf32>
    %124 = vector.shape_cast %123 : vector<1x1x128xf32> to vector<1x128xf32>
    %125 = vector.broadcast %124 : vector<1x128xf32> to vector<32x128xf32>
    %126 = arith.mulf %122, %125 : vector<32x128xf32>
    %c0_63 = arith.constant 0 : index
    %c0_64 = arith.constant 0 : index
    %c0_65 = arith.constant 0 : index
    %127 = vector.load %arg14[%c0_63, %c0_64, %c0_65] : memref<1x1x128xf32, #tpu.memory_space<vmem>>, vector<1x1x128xf32>
    %128 = vector.shape_cast %127 : vector<1x1x128xf32> to vector<1x128xf32>
    %129 = vector.broadcast %128 : vector<1x128xf32> to vector<32x128xf32>
    %130 = arith.addf %126, %129 : vector<32x128xf32>
    %131 = vector.shape_cast %130 : vector<32x128xf32> to vector<2x16x128xf32>
    %c0_66 = arith.constant 0 : index
    %c0_67 = arith.constant 0 : index
    %c0_68 = arith.constant 0 : index
    %132 = vector.load %arg15[%c0_66, %c0_67, %c0_68] : memref<2x16x128xf32, #tpu.memory_space<vmem>>, vector<2x16x128xf32>
    tpu.vector_store %arg15[%c0_66, %c0_67, %c0_68], %131 {strides = array<i32>} : memref<2x16x128xf32, #tpu.memory_space<vmem>>, vector<2x16x128xf32>,
    return
  }
  func.func @transform_0(%arg0: i32, %arg1: i32) -> (i32, i32, i32) {
    %c0_i32 = arith.constant 0 : i32
    %c0_i32_0 = arith.constant 0 : i32
    %c0_i32_1 = arith.constant 0 : i32
    return %arg0, %c0_i32, %c0_i32_0 : i32, i32, i32
  }
  func.func @transform_1(%arg0: i32, %arg1: i32) -> (i32, i32, i32) {
    %c0_i32 = arith.constant 0 : i32
    %c0_i32_0 = arith.constant 0 : i32
    %c0_i32_1 = arith.constant 0 : i32
    return %arg1, %c0_i32, %c0_i32_0 : i32, i32, i32
  }
  func.func @transform_2(%arg0: i32, %arg1: i32) -> (i32, i32, i32) {
    %c0_i32 = arith.constant 0 : i32
    %c0_i32_0 = arith.constant 0 : i32
    %c0_i32_1 = arith.constant 0 : i32
    return %arg1, %c0_i32, %c0_i32_0 : i32, i32, i32
  }
  func.func @transform_3(%arg0: i32, %arg1: i32) -> (i32, i32, i32) {
    %c0_i32 = arith.constant 0 : i32
    %c0_i32_0 = arith.constant 0 : i32
    %c0_i32_1 = arith.constant 0 : i32
    return %arg1, %c0_i32, %c0_i32_0 : i32, i32, i32
  }
  func.func @transform_4(%arg0: i32, %arg1: i32) -> (i32, i32, i32) {
    %c0_i32 = arith.constant 0 : i32
    %c0_i32_0 = arith.constant 0 : i32
    %c0_i32_1 = arith.constant 0 : i32
    return %arg1, %c0_i32, %c0_i32_0 : i32, i32, i32
  }
  func.func @transform_5(%arg0: i32, %arg1: i32) -> (i32, i32, i32) {
    %c0_i32 = arith.constant 0 : i32
    %c0_i32_0 = arith.constant 0 : i32
    %c0_i32_1 = arith.constant 0 : i32
    return %arg1, %c0_i32, %c0_i32_0 : i32, i32, i32
  }
  func.func @transform_6(%arg0: i32, %arg1: i32) -> (i32, i32, i32) {
    %c0_i32 = arith.constant 0 : i32
    %c0_i32_0 = arith.constant 0 : i32
    %c0_i32_1 = arith.constant 0 : i32
    return %arg1, %c0_i32, %c0_i32_0 : i32, i32, i32
  }
  func.func @transform_7(%arg0: i32, %arg1: i32) -> (i32, i32, i32) {
    %c0_i32 = arith.constant 0 : i32
    %c0_i32_0 = arith.constant 0 : i32
    %c0_i32_1 = arith.constant 0 : i32
    return %arg1, %c0_i32, %c0_i32_0 : i32, i32, i32
  }
  func.func @transform_8(%arg0: i32, %arg1: i32) -> (i32, i32, i32) {
    %c0_i32 = arith.constant 0 : i32
    %c0_i32_0 = arith.constant 0 : i32
    %c0_i32_1 = arith.constant 0 : i32
    return %arg1, %c0_i32, %c0_i32_0 : i32, i32, i32
  }
  func.func @transform_9(%arg0: i32, %arg1: i32) -> (i32, i32, i32) {
    %c0_i32 = arith.constant 0 : i32
    %c0_i32_0 = arith.constant 0 : i32
    %c0_i32_1 = arith.constant 0 : i32
    return %arg1, %c0_i32, %c0_i32_0 : i32, i32, i32
  }
  func.func @transform_10(%arg0: i32, %arg1: i32) -> (i32, i32, i32) {
    %c0_i32 = arith.constant 0 : i32
    %c0_i32_0 = arith.constant 0 : i32
    %c0_i32_1 = arith.constant 0 : i32
    return %arg1, %c0_i32, %c0_i32_0 : i32, i32, i32
  }
  func.func @transform_11(%arg0: i32, %arg1: i32) -> (i32, i32, i32) {
    %c0_i32 = arith.constant 0 : i32
    %c0_i32_0 = arith.constant 0 : i32
    %c0_i32_1 = arith.constant 0 : i32
    return %arg1, %c0_i32, %c0_i32_0 : i32, i32, i32
  }
  func.func @transform_12(%arg0: i32, %arg1: i32) -> (i32, i32, i32) {
    %c0_i32 = arith.constant 0 : i32
    %c0_i32_0 = arith.constant 0 : i32
    %c0_i32_1 = arith.constant 0 : i32
    return %arg1, %c0_i32, %c0_i32_0 : i32, i32, i32
  }
  func.func @transform_13(%arg0: i32, %arg1: i32) -> (i32, i32, i32) {
    %c0_i32 = arith.constant 0 : i32
    %c0_i32_0 = arith.constant 0 : i32
    %c0_i32_1 = arith.constant 0 : i32
    return %arg0, %c0_i32, %c0_i32_0 : i32, i32, i32
  }
}

</mosaic_0001>

<bundles_post_ra>
// kernel: tpu_custom_call.1
= control target key start
LH: loop header
LB: loop body
LE: loop exit
PB: predicated region body
PF: predicated region fallthrough
CT: control target
= control target key end

     0   :  { %s4526_s0 = inlined_call_operand.hbm [shape: f32[4,16,128], index: 0, kind: input, shape index: {}]   ;;  %s4527_s1 = inlined_call_operand.hbm [shape: bf16[2,128,768], index: 1, kind: input, shape index: {}]   ;;  %s4528_s2 = inlined_call_operand.hbm [shape: f32[2,1,768], index: 2, kind: input, shape index: {}]   ;;  %s4529_s3 = inlined_call_operand.hbm [shape: bf16[2,256,128], index: 3, kind: input, shape index: {}]   ;;  %s4530_s4 = inlined_call_operand.vmem [shape: f32[2,1,128], index: 4, kind: input, shape index: {}]   ;;  %s4531_s5 = inlined_call_operand.vmem [shape: f32[2,1,128], index: 5, kind: input, shape index: {}]   ;;  %s4532_s6 = inlined_call_operand.vmem [shape: f32[2,1,128], index: 6, kind: input, shape index: {}]   ;;  %s4533_s7 = inlined_call_operand.hbm [shape: bf16[2,128,256], index: 7, kind: input, shape index: {}]   ;;  %s4534_s8 = inlined_call_operand.vmem [shape: f32[2,1,256], index: 8, kind: input, shape index: {}]   ;;  %s4535_s9 = inlined_call_operand.hbm [shape: bf16[2,256,128], index: 9, kind: input, shape index: {}]   ;;  %s4536_s10 = inlined_call_operand.vmem [shape: f32[2,1,128], index: 10, kind: input, shape index: {}]   ;;  %s4537_s11 = inlined_call_operand.vmem [shape: f32[2,1,128], index: 11, kind: input, shape index: {}]   ;;  %s4538_s12 = inlined_call_operand.vmem [shape: f32[2,1,128], index: 12, kind: input, shape index: {}]   ;;  %s4539_s13 = inlined_call_operand.hbm [shape: f32[4,16,128], index: 13, kind: output, shape index: {}]  }
   0x1   :  { %4570 = sst [smem:[#allocation38_spill]] %s4526_s0 }
   0x2   :  { %4571 = sst [smem:[#allocation39_spill]] %s4527_s1 }
   0x3   :  { %4572 = sst [smem:[#allocation40_spill]] %s4528_s2 }
   0x4   :  { %4573 = sst [smem:[#allocation41_spill]] %s4529_s3 }
   0x5   :  { %4574 = sst [smem:[#allocation42_spill]] %s4530_s4 }
   0x6   :  { %4575 = sst [smem:[#allocation43_spill]] %s4531_s5 }
   0x7   :  { %4576 = sst [smem:[#allocation44_spill]] %s4532_s6 }
   0x8   :  { %4577 = sst [smem:[#allocation45_spill]] %s4533_s7 }
   0x9   :  { %4578 = sst [smem:[#allocation46_spill]] %s4534_s8 }
   0xa   :  { %4579 = sst [smem:[#allocation47_spill]] %s4535_s9 }
   0xb   :  { %4580 = sst [smem:[#allocation48_spill]] %s4536_s10 }
   0xc   :  { %4581 = sst [smem:[#allocation49_spill]] %s4537_s11 }
   0xd   :  { %4582 = sst [smem:[#allocation50_spill]] %s4538_s12 }
   0xe   :  { %4583 = sst [smem:[#allocation51_spill]] %s4539_s13 }
   0xf   :  { %18 = vsyncpa [#allocation4], 0 }
  0x10   :  { %20 = vsyncpa [#allocation4 + $0x1], 0 }
  0x11   :  { %21 = vsyncpa [#allocation7], 0 }
  0x12   :  { %23 = vsyncpa [#allocation7 + $0x1], 0 }
  0x13   :  { %24 = vsyncpa [#allocation10], 0 }
  0x14   :  { %26 = vsyncpa [#allocation10 + $0x1], 0 }
  0x15   :  { %27 = vsyncpa [#allocation13], 0 }
  0x16   :  { %29 = vsyncpa [#allocation13 + $0x1], 0 }
  0x17   :  { %30 = vsyncpa [#allocation5], 0 }
  0x18   :  { %32 = vsyncpa [#allocation5 + $0x1], 0  ;;  %s3690_s25 = smov 0   ;;  %s3692_s26 = smov 0  }
  0x19   :  { %s3694_s27 = smov 0   ;;  %s3696_s28 = smov 0  }
  0x1a   :  { %s3698_s29 = smov 0   ;;  %s3700_s30 = smov 0  }
  0x1b   :  { %s3702_s14 = smov 0   ;;  %s3704_s15 = smov 0  }
  0x1c   :  { %s3706_s16 = smov 0   ;;  %s3708_s17 = smov 0  }
  0x1d   :  { %s3710_s18 = smov 0  }
  0x1e LB: > { %4584 = sst [smem:[#allocation20_spill]] %s3564_s26  ;;  %p4542_p0 = scmp.eq.s32.totalorder %s3600_s18, 0  ;;  %s3600_s18 = sphi %s3710_s18, %s38_s18   ;;  %s3596_s17 = sphi %s3708_s17, %s4670_s17   ;;  %s3592_s16 = sphi %s3706_s16, %s4669_s16   ;;  %s3588_s15 = sphi %s3704_s15, %s4668_s15   ;;  %s3584_s14 = sphi %s3702_s14, %s4667_s14   ;;  %s3580_s30 = sphi %s3700_s30, %s4666_s30   ;;  %s3576_s29 = sphi %s3698_s29, %s4665_s29   ;;  %s3572_s28 = sphi %s3696_s28, %s4664_s28   ;;  %s3568_s27 = sphi %s3694_s27, %s4663_s27   ;;  %s3564_s26 = sphi %s3692_s26, %s4662_s26   ;;  %s3560_s25 = sphi %s3690_s25, %s4661_s25  }
  0x1f   : > { %4585 = sst [smem:[#allocation21_spill]] %s3568_s27  ;;  %p90_p1 = scmp.ne.s32.totalorder %s3568_s27, %s3564_s26 }
  0x20   : > { %4586 = sst [smem:[#allocation22_spill]] %s3572_s28  ;;  %p4541_p4 = scmp.lt.s32.totalorder %s3600_s18, 4 }
  0x21   : > { %4587 = sst [smem:[#allocation23_spill]] %s3576_s29  ;;  %p92_p3 = por %p90_p1, %p4542_p0 }
  0x22   : > { %4588 = sst [smem:[#allocation24_spill]] %s3580_s30  ;;  %s3757_s22 = sand.u32 1, %s3568_s27  }
  0x23   : > { %4589 = sst [smem:[#allocation25_spill]] %s3584_s14  ;;  %s2966_s23 = smul.u32 384, %s3757_s22 }
  0x24   : > { %4590 = sst [smem:[#allocation26_spill]] %s3588_s15  ;;  %s2967_s24 = smul.u32 6144, %s3592_s16 }
  0x25   : > { %4591 = sst [smem:[#allocation27_spill]] %s3592_s16  ;;  %p3763_p5 = pnand %p4541_p4, %p92_p3 }
  0x26   : > { %4592 = sst [smem:[#allocation28_spill]] %s3596_s17  ;;  %s4595_s1 = sld [smem:[#allocation39_spill]] }
  0x27   : > { %4593 = sst [smem:[#allocation29_spill]] %s3600_s18  ;;  %s458_s21 = scalar_lea.vmem [#allocation6], %s2966_s23 }
  0x28   : > { %s4594_s13 = scalar_select %p3763_p5, 1, 0 }
  0x29   : > { %s465_s12 = sshll.u32 %s458_s21, 4  ;;  %s4596_s11 = sand.u32 1, %s3600_s18   ;;  %s3772_s12 = int_to_ptr.vmem [resolvable:$true] %s465_s12 }
  0x2a   : > { %s3777_s10 = scalar_lea.sflag [#allocation7], %s4596_s11  ;;  %p3783_p8 = pneg %p3763_p5 }
  0x2c   : > { %s3770_s20 = scalar_lea.hbm %s4595_s1, %s2967_s24  ;;  %s3291_s21 = scalar_lea.hbm %s4595_s1, 12288 }
  0x2d   : > { %s3286_s8 = scalar_lea.hbm %s3770_s20, 6144  ;;  %p3292_p11 = scmp.lt.u32.totalorder %s3770_s20, %s4595_s1 }
  0x2e   : > { %p3287_p7 = scmp.ne.s32.totalorder %s3770_s20, %s3286_s8  ;;  %p3293_p12 = scmp.lt.u32.totalorder %s3291_s21, %s3286_s8 }
  0x2f   : > { %p3295_p1 = scmp.lt.u32.totalorder %s3286_s8, %s3770_s20 }
  0x30   : > { %p3289_p9 = pnand %p3783_p8, %p3287_p7  ;;  %p3294_p13 = por %p3293_p12, %p3292_p11 }
  0x32   : > { %p3290_p10 = pneg %p3289_p9  ;;  %p3296_p3 = por %p3295_p1, %p3294_p13 }
  0x34   : > { %p3297_p4 = pnand %p3296_p3, %p3290_p10 }
  0x36   : > { %3300 = shalt.err (!%p3297_p4)
}
  0x37   : > { %s3301_s11 = scalar_lea.vmem %s3772_s12, 6144  ;;  %s3602_s19 = smov [#allocation6]  }
  0x38   : > { %p3302_p7 = scmp.ne.s32.totalorder %s3772_s12, %s3301_s11  ;;  %s3306_s23 = sshll.u32 %s3602_s19, 4  ;;  %s3307_s23 = int_to_ptr.vmem [resolvable:$false] %s3306_s23 }
  0x39   : > { %s3308_s6 = scalar_lea.vmem %s3307_s23, 12288  ;;  %p3309_p0 = scmp.lt.s32.totalorder %s3772_s12, %s3307_s23 }
  0x3a   : > { %p3304_p9 = pnand %p3302_p7, %p3783_p8  ;;  %p3310_p6 = scmp.lt.s32.totalorder %s3308_s6, %s3301_s11 }
  0x3c   : > { %p3305_p2 = pneg %p3304_p9  ;;  %p3311_p11 = por %p3310_p6, %p3309_p0 }
  0x3e   : > { %p3312_p12 = pnand %p3311_p11, %p3305_p2 }
  0x40   : > { %3315 = shalt.err (!%p3312_p12)
}
  0x41   : > { %s3603_s8 = smov 384   ;;  %s3604_s21 = smov 24  }
  0x42   : > { %2992 = dma.hbm_to_vmem [thread:$0]  (!%p3763_p5), %s3770_s20, 6144, %s3772_s12, %s3777_s10, %s3603_s8, %s3603_s8, %s3604_s21  }
  0x43   : > { %p598_p4 = scmp.lt.s32.totalorder %s3600_s18, 5  ;;  %s3809_s24 = sshll.u32 %s3757_s22, 7 }
  0x44   : > { %s3812_s11 = sshll.u32 %s3592_s16, 11  ;;  %p4598_p0 = scmp.ge.s32.totalorder %s3600_s18, 1 }
  0x45   : > { %s4601_s3 = sld [smem:[#allocation41_spill]]  ;;  %s498_s12 = scalar_lea.vmem [#allocation9], %s3809_s24 }
  0x46   : > { %p3816_p2 = pnand %p4598_p0, %p598_p4  ;;  %s505_s20 = sshll.u32 %s498_s12, 4  ;;  %s3827_s20 = int_to_ptr.vmem [resolvable:$true] %s505_s20 }
  0x47   : > { %s4602_s8 = sand.u32 1, %s3600_s18  }
  0x48   : > { %s4599_s19 = scalar_select %p3816_p2, 1, 0 }
  0x49   : > { %s3831_s21 = scalar_lea.sflag [#allocation10], %s4602_s8 }
  0x4a   : > { %4600 = sst [smem:[#allocation30_spill]] %s4599_s19 }
  0x4b   : > { %s3824_s1 = scalar_lea.hbm %s4601_s3, %s3812_s11  ;;  %4603 = sst [smem:[#allocation31_spill]] %s3831_s21 }
  0x4c   : > { %s3316_s5 = scalar_lea.hbm %s3824_s1, 2048  ;;  %s3321_s6 = scalar_lea.hbm %s4601_s3, 4096 }
  0x4d   : > { %p3317_p6 = scmp.ne.s32.totalorder %s3824_s1, %s3316_s5  ;;  %p3322_p1 = scmp.lt.u32.totalorder %s3824_s1, %s4601_s3 }
  0x4e   : > { %p3323_p3 = scmp.lt.u32.totalorder %s3321_s6, %s3316_s5  ;;  %p3325_p9 = scmp.lt.u32.totalorder %s3316_s5, %s3824_s1 }
  0x4f   : > { %p3319_p10 = pnand %p3317_p6, %p3783_p8 }
  0x50   : > { %p3324_p7 = por %p3323_p3, %p3322_p1 }
  0x51   : > { %p3320_p13 = pneg %p3319_p10 }
  0x52   : > { %p3326_p11 = por %p3325_p9, %p3324_p7 }
  0x54   : > { %p3327_p12 = pnand %p3326_p11, %p3320_p13 }
  0x56   : > { %3330 = shalt.err (!%p3327_p12)
}
  0x57   : > { %s3331_s12 = scalar_lea.vmem %s3827_s20, 2048  ;;  %s3605_s4 = smov [#allocation9]  }
  0x58   : > { %p3332_p4 = scmp.ne.s32.totalorder %s3827_s20, %s3331_s12  ;;  %s3336_s8 = sshll.u32 %s3605_s4, 4  ;;  %s3337_s8 = int_to_ptr.vmem [resolvable:$false] %s3336_s8 }
  0x59   : > { %s3338_s14 = scalar_lea.vmem %s3337_s8, 4096  ;;  %p3339_p10 = scmp.lt.s32.totalorder %s3827_s20, %s3337_s8 }
  0x5a   : > { %p3334_p0 = pnand %p3332_p4, %p3783_p8  ;;  %p3340_p2 = scmp.lt.s32.totalorder %s3338_s14, %s3331_s12 }
  0x5c   : > { %p3335_p6 = pneg %p3334_p0  ;;  %p3341_p1 = por %p3340_p2, %p3339_p10 }
  0x5e   : > { %p3342_p3 = pnand %p3341_p1, %p3335_p6 }
  0x60   : > { %3345 = shalt.err (!%p3342_p3)
}
  0x61   : > { %s4545_s5 = smov 64   ;;  %s4546_s19 = smov 4  }
  0x62   : > { %2998 = dma.hbm_to_vmem [thread:$0]  (!%p3763_p5), %s3824_s1, 2048, %s3827_s20, %s3831_s21, %s4545_s5, %s4545_s5, %s4546_s19  }
  0x63   : > { %s3859_s23 = sadd.s32 4294967295, %s3600_s18   ;;  %s2685_s6 = sadd.s32 4294967294, %s3600_s18  }
  0x64   : > { %s4604_s12 = sadd.s32 1, %s3592_s16  ;;  %s50_s4 = sadd.s32 1, %s3596_s17 }
  0x65   : > { %p48_p2 = scmp.ge.s32.totalorder %s4604_s12, 2  ;;  %s57_s8 = sadd.s32 1, %s3580_s30 }
  0x66   : > { %s4605_s14 = smov %s4604_s12  ;;  %p64_p13 = scmp.ne.s32.totalorder %s3580_s30, %s3576_s29 }
  0x67   : > { %s4672_s14 = smov (%p48_p2, %s4605_s14), 0  ;;  %s4674_s4 = smov (!%p48_p2, %s50_s4), %s3596_s17 }
  0x68   : > { %4606 = sst [smem:[#allocation32_spill]] %s4672_s14  ;;  %p70_p7 = scmp.ne.s32.totalorder %s3576_s29, %s3572_s28 }
  0x69   : > { %p52_p9 = scmp.ge.s32.totalorder %s4674_s4, 2  ;;  %p71_p11 = scmp.eq.s32.totalorder %s3859_s23, 0 }
  0x6a   : > { %p4607_p12 = scmp.eq.s32.totalorder %s3600_s18, 0  ;;  %s80_s20 = ssub.s32 %s3592_s16, %s4672_s14 }
  0x6b   : > { %s4676_s4 = smov (%p52_p9, %s4674_s4), 0  ;;  %p3892_p0 = por %p71_p11, %p70_p7 }
  0x6c   : > { %p3881_p4 = por %p4607_p12, %p64_p13  ;;  %4609 = sst [smem:[#allocation33_spill]] %s4676_s4 }
  0x6d   : > { %s4610_s12 = scalar_select %p3892_p0, 1, 0 }
  0x6e   : > { %p81_p6 = scmp.eq.s32.totalorder %s80_s20, 0  ;;  %s54_s5 = ssub.s32 %s3596_s17, %s4676_s4 }
  0x6f   : > { %p4611_p10 = scmp.ne.s32.totalorder %s3564_s26, %s3560_s25  ;;  %p55_p3 = scmp.eq.s32.totalorder %s54_s5, 0 }
  0x70   : > { %p406_p2 = scmp.eq.s32.totalorder %s3859_s23, 3  ;;  %s4614_s3 = sadd.s32 1, %s3568_s27 }
  0x71   : > { %p3901_p1 = por %p4611_p10, %p71_p11  ;;  %p412_p12 = scmp.eq.s32.totalorder %s2685_s6, 3 }
  0x72   : > { %s3909_s14 = scalar_select %p81_p6, %s3568_s27, %s4614_s3  }
  0x73   : > { %s4612_s19 = scalar_select %p3901_p1, 1, 0 }
  0x74   : > { %4615 = sst [smem:[#allocation35_spill]] %s3909_s14  ;;  %p3917_p9 = por %p406_p2, %p64_p13 }
  0x75   : > { %4613 = sst [smem:[#allocation34_spill]] %s4612_s19  ;;  %s432_s20 = sand.u32 1, %s3580_s30  }
  0x76   : > { %s3912_s9 = scalar_select %p55_p3, %s3580_s30, %s57_s8  }
  0x77   : > { %s4617_s21 = scalar_select %p3917_p9, 1, 0 }
  0x78   : > { %4616 = sst [smem:[#allocation36_spill]] %s3912_s9  ;;  %s2824_s25 = sshll.u32 %s3596_s17, 9 }
  0x79   : > { %p3926_p11 = por %p412_p12, %p70_p7  ;;  %s2688_s5 = sshll.u32 %s432_s20, 5 }
  0x7a   : > { %s4620_s0 = sld [smem:[#allocation38_spill]]  ;;  %p4621_p6 = scmp.lt.s32.totalorder %s3600_s18, 4 }
  0x7b   : > { %s4618_s4 = scalar_select %p3926_p11, 1, 0 }
  0x7c   : > { %p3939_p13 = pnand %p4621_p6, %p3881_p4  ;;  %s436_s8 = scalar_lea.vmem [#allocation3], %s2688_s5 }
  0x7d   : > { %4619 = sst [smem:[#allocation37_spill]] %s4618_s4  ;;  %s444_s17 = sshll.u32 %s436_s8, 4  ;;  %s3943_s17 = int_to_ptr.vmem [resolvable:$true] %s444_s17 }
  0x7e   : > { %s2968_s9 = smul.u32 6, %s3757_s22  ;;  %s3946_s26 = scalar_lea.sflag [#allocation4], %s432_s20 }
  0x7f   : > { %p3348_p10 = pneg %p3939_p13 }
  0x80   : > { %s3933_s3 = scalar_lea.hbm %s4620_s0, %s2824_s25  ;;  %s3351_s30 = scalar_lea.hbm %s4620_s0, 1024 }
  0x81   : > { %s3346_s19 = scalar_lea.hbm %s3933_s3, 512  ;;  %p3352_p2 = scmp.lt.u32.totalorder %s3933_s3, %s4620_s0 }
  0x82   : > { %p3347_p7 = scmp.ne.s32.totalorder %s3933_s3, %s3346_s19  ;;  %p3353_p12 = scmp.lt.u32.totalorder %s3351_s30, %s3346_s19 }
  0x83   : > { %p3355_p11 = scmp.lt.u32.totalorder %s3346_s19, %s3933_s3 }
  0x84   : > { %p3349_p3 = pnand %p3348_p10, %p3347_p7  ;;  %p3354_p6 = por %p3353_p12, %p3352_p2 }
  0x86   : > { %p3350_p4 = pneg %p3349_p3  ;;  %p3356_p9 = por %p3355_p11, %p3354_p6 }
  0x88   : > { %p3357_p1 = pnand %p3356_p9, %p3350_p4 }
  0x8a   : > { %3360 = shalt.err (!%p3357_p1)
}
  0x8b   : > { %s3361_s20 = scalar_lea.vmem %s3943_s17, 512  ;;  %s3608_s8 = smov [#allocation3]  }
  0x8c   : > { %p3362_p7 = scmp.ne.s32.totalorder %s3943_s17, %s3361_s20  ;;  %s3366_s1 = sshll.u32 %s3608_s8, 4  ;;  %s3367_s1 = int_to_ptr.vmem [resolvable:$false] %s3366_s1 }
  0x8d   : > { %s3368_s14 = scalar_lea.vmem %s3367_s1, 1024  ;;  %p3369_p5 = scmp.lt.s32.totalorder %s3943_s17, %s3367_s1 }
  0x8e   : > { %p3364_p3 = pnand %p3362_p7, %p3348_p10  ;;  %p3370_p2 = scmp.lt.s32.totalorder %s3368_s14, %s3361_s20 }
  0x90   : > { %p3365_p0 = pneg %p3364_p3  ;;  %p3371_p12 = por %p3370_p2, %p3369_p5 }
  0x92   : > { %p3372_p11 = pnand %p3371_p12, %p3365_p0 }
  0x94   : > { %3375 = shalt.err (!%p3372_p11)
}
  0x95   : > { %s3609_s30 = smov 128   ;;  %s3610_s19 = smov 8  }
  0x96   : > { %2989 = dma.hbm_to_vmem [thread:$0]  (!%p3939_p13), %s3933_s3, 512, %s3943_s17, %s3946_s26, %s3609_s30, %s3609_s30, %s3610_s19  }
  0x97   : > { %s2969_s25 = smul.u32 96, %s3592_s16  ;;  %s479_s5 = scalar_lea.vmem [#allocation8], %s2968_s9 }
  0x98   : > { %s487_s20 = sshll.u32 %s479_s5, 4  ;;  %s4623_s2 = sld [smem:[#allocation40_spill]]  ;;  %s488_s20 = int_to_ptr.vmem [resolvable:$true] %s487_s20 }
  0x9e   : > { %s485_s14 = scalar_lea.hbm %s4623_s2, %s2969_s25  ;;  %s3381_s4 = scalar_lea.hbm %s4623_s2, 192 }
  0x9f   : > { %s3376_s0 = scalar_lea.hbm %s485_s14, 96  ;;  %p3382_p9 = scmp.lt.u32.totalorder %s485_s14, %s4623_s2 }
  0xa0   : > { %p3377_p5 = scmp.ne.s32.totalorder %s485_s14, %s3376_s0  ;;  %p3383_p13 = scmp.lt.u32.totalorder %s3381_s4, %s3376_s0 }
  0xa1   : > { %p3385_p4 = scmp.lt.u32.totalorder %s3376_s0, %s485_s14 }
  0xa2   : > { %p3379_p0 = pnand %p3377_p5, %p3783_p8  ;;  %p3384_p10 = por %p3383_p13, %p3382_p9 }
  0xa4   : > { %p3380_p1 = pneg %p3379_p0  ;;  %p3386_p6 = por %p3385_p4, %p3384_p10 }
  0xa6   : > { %p3387_p7 = pnand %p3386_p6, %p3380_p1 }
  0xa8   : > { %3390 = shalt.err (!%p3387_p7)
}
  0xa9   : > { %s3391_s9 = scalar_lea.vmem %s488_s20, 96  ;;  %s3611_s3 = smov [#allocation8]  }
  0xaa   : > { %p3392_p3 = scmp.ne.s32.totalorder %s488_s20, %s3391_s9  ;;  %s3396_s26 = sshll.u32 %s3611_s3, 4  ;;  %s3397_s26 = int_to_ptr.vmem [resolvable:$false] %s3396_s26 }
  0xab   : > { %s3398_s27 = scalar_lea.vmem %s3397_s26, 192  ;;  %p3399_p11 = scmp.lt.s32.totalorder %s488_s20, %s3397_s26 }
  0xac   : > { %p3394_p2 = pnand %p3392_p3, %p3783_p8  ;;  %p3400_p5 = scmp.lt.s32.totalorder %s3398_s27, %s3391_s9 }
  0xae   : > { %p3395_p12 = pneg %p3394_p2  ;;  %p3401_p0 = por %p3400_p5, %p3399_p11 }
  0xb0   : > { %p3402_p9 = pnand %p3401_p0, %p3395_p12 }
  0xb2   : > { %3405 = shalt.err (!%p3402_p9)
}
  0xb3   : > { %p4624_p13 = scmp.ne.s32.totalorder %s4594_s13, 0  ;;  %s4625_s7 = sld [smem:[#allocation45_spill]] }
  0xb4   : > { %s537_s25 = scalar_lea.vmem [#allocation11], %s3809_s24 }
  0xb5   : > { %2995 = dma.hbm_to_vmem [thread:$0]  (!%p4624_p13), %s485_s14, 96, %s488_s20, %s3777_s10  }
  0xb6   : > { %s544_s5 = sshll.u32 %s537_s25, 4  ;;  %s4003_s5 = int_to_ptr.vmem [resolvable:$true] %s544_s5 }
  0xb9   : > { %s4000_s4 = scalar_lea.hbm %s4625_s7, %s3812_s11  ;;  %s3411_s20 = scalar_lea.hbm %s4625_s7, 4096 }
  0xba   : > { %s3406_s8 = scalar_lea.hbm %s4000_s4, 2048  ;;  %p3412_p6 = scmp.lt.u32.totalorder %s4000_s4, %s4625_s7 }
  0xbb   : > { %p3407_p1 = scmp.ne.s32.totalorder %s4000_s4, %s3406_s8  ;;  %p3413_p7 = scmp.lt.u32.totalorder %s3411_s20, %s3406_s8 }
  0xbc   : > { %p3415_p2 = scmp.lt.u32.totalorder %s3406_s8, %s4000_s4 }
  0xbd   : > { %p3409_p10 = pnand %p3407_p1, %p3783_p8  ;;  %p3414_p3 = por %p3413_p7, %p3412_p6 }
  0xbf   : > { %p3410_p4 = pneg %p3409_p10  ;;  %p3416_p12 = por %p3415_p2, %p3414_p3 }
  0xc1   : > { %p3417_p11 = pnand %p3416_p12, %p3410_p4 }
  0xc3   : > { %3420 = shalt.err (!%p3417_p11)
}
  0xc4   : > { %s3421_s17 = scalar_lea.vmem %s4003_s5, 2048  ;;  %s3612_s9 = smov [#allocation11]  }
  0xc5   : > { %p3422_p5 = scmp.ne.s32.totalorder %s4003_s5, %s3421_s17  ;;  %s3426_s3 = sshll.u32 %s3612_s9, 4  ;;  %s3427_s3 = int_to_ptr.vmem [resolvable:$false] %s3426_s3 }
  0xc6   : > { %s3428_s26 = scalar_lea.vmem %s3427_s3, 4096  ;;  %p3429_p1 = scmp.lt.s32.totalorder %s4003_s5, %s3427_s3 }
  0xc7   : > { %p3424_p0 = pnand %p3422_p5, %p3783_p8  ;;  %p3430_p10 = scmp.lt.s32.totalorder %s3428_s26, %s3421_s17 }
  0xc9   : > { %p3425_p9 = pneg %p3424_p0  ;;  %p3431_p6 = por %p3430_p10, %p3429_p1 }
  0xcb   : > { %p3432_p7 = pnand %p3431_p6, %p3425_p9 }
  0xcd   : > { %3435 = shalt.err (!%p3432_p7)
}
  0xce   : > { %s4626_s27 = sld [smem:[#allocation31_spill]]  ;;  %s4627_s25 = sld [smem:[#allocation47_spill]] }
  0xcf   : > { %s565_s10 = scalar_lea.vmem [#allocation12], %s3809_s24  ;;  %s562_s14 = scalar_lea.sflag [#allocation13], %s3757_s22 }
  0xd0   : > { %s572_s20 = sshll.u32 %s565_s10, 4  ;;  %s4037_s20 = int_to_ptr.vmem [resolvable:$true] %s572_s20 }
  0xd4   : > { %3001 = dma.hbm_to_vmem [thread:$0]  (!%p4624_p13), %s4000_s4, 2048, %s4003_s5, %s4626_s27, %s3609_s30, %s3609_s30, %s3610_s19  }
  0xd5   : > { %s4628_s8 = smov %s4627_s25  ;;  %s4034_s1 = scalar_lea.hbm %s4627_s25, %s3812_s11 }
  0xd6   : > { %s3436_s6 = scalar_lea.hbm %s4034_s1, 2048  ;;  %s3441_s4 = scalar_lea.hbm %s4628_s8, 4096 }
  0xd7   : > { %p3437_p4 = scmp.ne.s32.totalorder %s4034_s1, %s3436_s6  ;;  %p3442_p12 = scmp.lt.u32.totalorder %s4034_s1, %s4628_s8 }
  0xd8   : > { %p3443_p11 = scmp.lt.u32.totalorder %s3441_s4, %s3436_s6  ;;  %p3445_p0 = scmp.lt.u32.totalorder %s3436_s6, %s4034_s1 }
  0xd9   : > { %p3439_p3 = pnand %p3437_p4, %p3783_p8 }
  0xda   : > { %p3444_p5 = por %p3443_p11, %p3442_p12 }
  0xdb   : > { %p3440_p2 = pneg %p3439_p3 }
  0xdc   : > { %p3446_p9 = por %p3445_p0, %p3444_p5 }
  0xde   : > { %p3447_p1 = pnand %p3446_p9, %p3440_p2 }
  0xe0   : > { %3450 = shalt.err (!%p3447_p1)
}
  0xe1   : > { %s3451_s24 = scalar_lea.vmem %s4037_s20, 2048  ;;  %s3613_s17 = smov [#allocation12]  }
  0xe2   : > { %p3452_p10 = scmp.ne.s32.totalorder %s4037_s20, %s3451_s24  ;;  %s3456_s9 = sshll.u32 %s3613_s17, 4  ;;  %s3457_s9 = int_to_ptr.vmem [resolvable:$false] %s3456_s9 }
  0xe3   : > { %s3458_s3 = scalar_lea.vmem %s3457_s9, 4096  ;;  %p3459_p4 = scmp.lt.s32.totalorder %s4037_s20, %s3457_s9 }
  0xe4   : > { %p3454_p6 = pnand %p3452_p10, %p3783_p8  ;;  %p3460_p3 = scmp.lt.s32.totalorder %s3458_s3, %s3451_s24 }
  0xe6   : > { %p3455_p7 = pneg %p3454_p6  ;;  %p3461_p12 = por %p3460_p3, %p3459_p4 }
  0xe8   : > { %p3462_p11 = pnand %p3461_p12, %p3455_p7 }
  0xea   : > { %3465 = shalt.err (!%p3462_p11)
}
  0xeb   : > { %s4629_s26 = smov 4   ;;  %s4630_s27 = smov 64  }
  0xec   : > { %3004 = dma.hbm_to_vmem [thread:$0]  (!%p4624_p13), %s4034_s1, 2048, %s4037_s20, %s562_s14, %s4630_s27, %s4630_s27, %s4629_s26  }
  0xed   : > { %s4631_s15 = sld [smem:[#allocation30_spill]] }
  0xf3   : > { %p4632_p8 = scmp.ne.s32.totalorder %s4631_s15, 0 }
  0xf4   : > { %s4069_s0 = sand.u32 (!%p4632_p8), 1, %s3576_s29   ;;  %p4633_p2 = scmp.ne.s32.totalorder (!%p4632_p8), %s4610_s12, 0 }
  0xf5   : > { %602 = sbr.rel (%p4632_p8) target bundleno = 3145 (0xc49), region = 72  ;;  %s4564_s28 = sshll.u32 (!%p4632_p8), %s4069_s0, 5 }
  0xf6   : > { %s605_s13 = scalar_lea.sflag (!%p4632_p8), [#allocation4], %s4069_s0  ;;  %s4075_s25 = scalar_lea.vmem (!%p4632_p8), [#allocation3], %s4564_s28 }
  0xfc   : > { %3539 = dma.done.wait (%p4633_p2), %s605_s13, 512  }
  0xfd   : > { %3541 = vsyncadd (%p4633_p2), %s605_s13, 4294966784  ;;  %s4634_s22 = sld [smem:[#allocation20_spill]]  ;;  %s613_s10 = sand.u32 1, %s3859_s23  }
  0xfe   : > { %s4635_s1 = sld [smem:[#allocation34_spill]]  ;;  %s614_s6 = scalar_lea.sflag [#allocation7], %s613_s10 }
 0x103   : > { %s615_s20 = sand.u32 1, %s4634_s22  }
 0x104   : > { %s2970_s14 = smul.u32 384, %s615_s20  ;;  %p4636_p13 = scmp.ne.s32.totalorder %s4635_s1, 0 }
 0x106   : > { %s4083_s30 = scalar_lea.vmem [#allocation6], %s2970_s14 }
 0x107   : > { %3543 = dma.done.wait (%p4636_p13), %s614_s6, 6240  }
 0x108   : > { %3545 = vsyncadd (%p4636_p13), %s614_s6, 4294961056  ;;  %s2971_s19 = smul.u32 6, %s615_s20  ;;  %s2705_s4 = sshll.u32 %s615_s20, 7 }
 0x109   : > { %s632_s12 = scalar_lea.sflag [#allocation10], %s613_s10  ;;  %s4091_s5 = scalar_lea.vmem [#allocation9], %s2705_s4 }
 0x10a   : > { %s4089_s11 = scalar_lea.vmem [#allocation8], %s2971_s19 }
 0x10b   : > { %3547 = dma.done.wait (%p4636_p13), %s632_s12, 4096  }
 0x10c   : > { %3549 = vsyncadd (%p4636_p13), %s632_s12, 4294963200  ;;  %s4097_s23 = scalar_lea.vmem [#allocation11], %s2705_s4  ;;  %s650_s24 = scalar_lea.sflag [#allocation13], %s615_s20 }
 0x10d   : > { %s4099_s17 = scalar_lea.vmem [#allocation12], %s2705_s4 }
 0x10e   : > { %3551 = dma.done.wait (%p4636_p13), %s650_s24, 2048  }
 0x10f   : > { %3553 = vsyncadd (%p4636_p13), %s650_s24, 4294965248  ;;  %s4637_s9 = sld [smem:[#allocation25_spill]]  ;;  %s4640_s19 = sld [smem:[#allocation44_spill]] }
 0x110   : > { %s4641_s2 = sld [smem:[#allocation46_spill]]  ;;  %s4642_s8 = sld [smem:[#allocation48_spill]] }
 0x111   : > { %s4643_s13 = sld [smem:[#allocation49_spill]]  ;;  %s4644_s10 = sld [smem:[#allocation50_spill]] }
 0x112   : > { %s4645_s14 = sshll.u32 %s4069_s0, 5 }
 0x113   : > { %s4141_s6 = scalar_lea.vmem [#allocation14], %s4645_s14 }
 0x115   : > { %p744_p5 = scmp.lt.s32.totalorder %s4637_s9, 1  ;;  %p2710_p0 = scmp.ne.s32.totalorder %s4637_s9, 0 }
 0x116   : > { %v772_v0 = vld [vmem:[%s4075_s25] sm:$0xff] (!%p2710_p0)  ;;  %v773_v1 = vld [vmem:[%s4075_s25 + $0x8] sm:$0xff] (!%p2710_p0)  ;;  %v774_v2 = vld [vmem:[%s4075_s25 + $0x10] sm:$0xff] (!%p2710_p0) }
 0x117   : > { %s4107_s3 = scalar_select %p744_p5, %s4637_s9, 1 }
 0x118   : > { %771 = sbr.rel (%p2710_p0) target bundleno = 287 (0x11f), region = 100  ;;  %776 = vst [vmem:[%s4141_s6] sm:$0xff] (!%p2710_p0), %v772_v0  ;;  %777 = vst [vmem:[%s4141_s6 + $0x8] sm:$0xff] (!%p2710_p0), %v773_v1  ;;  %v775_v3 = vld [vmem:[%s4075_s25 + $0x18] sm:$0xff] (!%p2710_p0) }
 0x119   : > { %s752_s4 = scalar_lea.vmem %s4640_s19, %s4107_s3  ;;  %s2709_s12 = sshll.u32 %s4107_s3, 1  ;;  %778 = vst [vmem:[%s4141_s6 + $0x10] sm:$0xff] (!%p2710_p0), %v774_v2  ;;  %779 = vst [vmem:[%s4141_s6 + $0x18] sm:$0xff] (!%p2710_p0), %v775_v3 }
 0x11a   : > { %s4125_s26 = scalar_lea.vmem %s4641_s2, %s2709_s12  ;;  %s759_s16 = scalar_lea.vmem %s4642_s8, %s4107_s3 }
 0x11b   : > { %s762_s18 = scalar_lea.vmem %s4643_s13, %s4107_s3  ;;  %s765_s20 = scalar_lea.vmem %s4644_s10, %s4107_s3 }
 0x11f PF: > { %v3110_v4 = vld [vmem:[%s4083_s30 + $0xc] ss:$24 sps:$4 sm:$0xff]   ;;  %v3112_v5 = vld [vmem:[%s4083_s30 + $0x8] ss:$24 sps:$4 sm:$0xff]   ;;  %v3614_v6 = vmov 0   ;;  %v4189_v37 = vld [vmem:[%s4141_s6 + $0x8] sm:$0xff]  ;;  %v836_v60 = vlaneseq }
 0x120   : > { %1191 = vmatprep.mubr.bf16.mxu1 %v3614_v6  ;;  %1138 = vmatprep.mubr.bf16.mxu0 %v3614_v6  ;;  %v3113_v7 = vld [vmem:[%s4083_s30 + $0x4] ss:$24 sps:$4 sm:$0xff]   ;;  %v3117_v9 = vld [vmem:[%s4083_s30] ss:$24 sps:$4 sm:$0xff]   ;;  %v3119_v11 = vld [vmem:[%s4083_s30 + $0x34] ss:$24 sps:$4 sm:$0xff]  }
 0x121   : > { %1159 = vmatprep.subr.bf16.mxu1 %v3110_v4  ;;  %v3115_v8 = vld [vmem:[%s4083_s30 + $0x3c] ss:$24 sps:$4 sm:$0xff]   ;;  %v3118_v10 = vld [vmem:[%s4083_s30 + $0x38] ss:$24 sps:$4 sm:$0xff]   ;;  %1106 = vmatprep.subr.bf16.mxu0 %v3113_v7  ;;  %v3121_v12 = vld [vmem:[%s4083_s30 + $0x6c] ss:$24 sps:$4 sm:$0xff]  }
 0x122   : > { %1160 = vmatpush1.bf16.msra.mxu1 %v3112_v5  ;;  %1107 = vmatpush1.bf16.msra.mxu0 %v3117_v9  ;;  %v3123_v13 = vld [vmem:[%s4083_s30 + $0x30] ss:$24 sps:$4 sm:$0xff]   ;;  %v3125_v15 = vld [vmem:[%s4083_s30 + $0x64] ss:$24 sps:$4 sm:$0xff]   ;;  %v3129_v17 = vld [vmem:[%s4083_s30 + $0x60] ss:$24 sps:$4 sm:$0xff]  }
 0x123   : > { %1161 = vmatprep.subr.bf16.mxu1 %v3115_v8  ;;  %1108 = vmatprep.subr.bf16.mxu0 %v3119_v11  ;;  %v3124_v14 = vld [vmem:[%s4083_s30 + $0x68] ss:$24 sps:$4 sm:$0xff]   ;;  %v3127_v16 = vld [vmem:[%s4083_s30 + $0x9c] ss:$24 sps:$4 sm:$0xff]   ;;  %v3130_v19 = vld [vmem:[%s4083_s30 + $0x98] ss:$24 sps:$4 sm:$0xff]  }
 0x124   : > { %v3131_v18 = vld [vmem:[%s4083_s30 + $0x94] ss:$24 sps:$4 sm:$0xff]   ;;  %v3135_v21 = vld [vmem:[%s4083_s30 + $0x90] ss:$24 sps:$4 sm:$0xff]   ;;  %v3137_v22 = vld [vmem:[%s4083_s30 + $0xc4] ss:$24 sps:$4 sm:$0xff]  }
 0x125   : > { %v3133_v20 = vld [vmem:[%s4083_s30 + $0xcc] ss:$24 sps:$4 sm:$0xff]   ;;  %v3136_v23 = vld [vmem:[%s4083_s30 + $0xc8] ss:$24 sps:$4 sm:$0xff]   ;;  %v3139_v24 = vld [vmem:[%s4083_s30 + $0xfc] ss:$24 sps:$4 sm:$0xff]  }
 0x126   : > { %1162 = vmatpush1.bf16.msra.mxu1 %v3118_v10  ;;  %1109 = vmatpush1.bf16.msra.mxu0 %v3123_v13  ;;  %v3141_v25 = vld [vmem:[%s4083_s30 + $0xc0] ss:$24 sps:$4 sm:$0xff]   ;;  %v3143_v26 = vld [vmem:[%s4083_s30 + $0xf4] ss:$24 sps:$4 sm:$0xff]   ;;  %v3147_v29 = vld [vmem:[%s4083_s30 + $0xf0] ss:$24 sps:$4 sm:$0xff]  }
 0x127   : > { %1163 = vmatprep.subr.bf16.mxu1 %v3121_v12  ;;  %1110 = vmatprep.subr.bf16.mxu0 %v3125_v15  ;;  %v3142_v27 = vld [vmem:[%s4083_s30 + $0xf8] ss:$24 sps:$4 sm:$0xff]   ;;  %v3145_v28 = vld [vmem:[%s4083_s30 + $0x12c] ss:$24 sps:$4 sm:$0xff]   ;;  %v3148_v31 = vld [vmem:[%s4083_s30 + $0x128] ss:$24 sps:$4 sm:$0xff]  }
 0x128   : > { %v3149_v30 = vld [vmem:[%s4083_s30 + $0x124] ss:$24 sps:$4 sm:$0xff]   ;;  %v3153_v33 = vld [vmem:[%s4083_s30 + $0x120] ss:$24 sps:$4 sm:$0xff]   ;;  %v3155_v35 = vld [vmem:[%s4083_s30 + $0x154] ss:$24 sps:$4 sm:$0xff]  }
 0x129   : > { %v3151_v32 = vld [vmem:[%s4083_s30 + $0x15c] ss:$24 sps:$4 sm:$0xff]   ;;  %v3154_v34 = vld [vmem:[%s4083_s30 + $0x158] ss:$24 sps:$4 sm:$0xff]   ;;  %v4201_v44 = vld [vmem:[%s4141_s6 + $0x18] sm:$0xff]  ;;  %v3615_v59 = vmov 0.0  }
 0x12a   : > { %1164 = vmatpush1.bf16.msra.mxu1 %v3124_v14  ;;  %1111 = vmatpush1.bf16.msra.mxu0 %v3129_v17  ;;  %v4186_v36 = vld [vmem:[%s4141_s6] sm:$0xff]  ;;  %v3163_v42 = vld [vmem:[%s4083_s30 + $0x44] ss:$24 sps:$4 sm:$0xff]   ;;  %v3161_v45 = vld [vmem:[%s4083_s30 + $0x40] ss:$24 sps:$4 sm:$0xff]   ;;  %vm3616_vm0 = vmmov 0  }
 0x12b   : > { %1165 = vmatprep.subr.bf16.mxu1 %v3127_v16  ;;  %1112 = vmatprep.subr.bf16.mxu0 %v3131_v18  ;;  %v3160_v38 = vld [vmem:[%s4083_s30 + $0x14] ss:$24 sps:$4 sm:$0xff]   ;;  %v3157_v39 = vld [vmem:[%s4083_s30 + $0x150] ss:$24 sps:$4 sm:$0xff]   ;;  %v784_v40 = vpack.c.bf16 %v4189_v37, %v4186_v36  ;;  %v4198_v43 = vld [vmem:[%s4141_s6 + $0x10] sm:$0xff]  ;;  %v4228_v61 = vshrl.u32 %v836_v60, 7 }
 0x12c   : > { %v3158_v41 = vld [vmem:[%s4083_s30 + $0x10] ss:$24 sps:$4 sm:$0xff]   ;;  %v3166_v46 = vld [vmem:[%s4083_s30 + $0x74] ss:$24 sps:$4 sm:$0xff]   ;;  %v785_v48 = vpack.c.bf16 %v4201_v44, %v4198_v43  ;;  %v3169_v49 = vld [vmem:[%s4083_s30 + $0xa4] ss:$24 sps:$4 sm:$0xff]  }
 0x12d   : > { %v3164_v47 = vld [vmem:[%s4083_s30 + $0x70] ss:$24 sps:$4 sm:$0xff]   ;;  %v3167_v50 = vld [vmem:[%s4083_s30 + $0xa0] ss:$24 sps:$4 sm:$0xff]   ;;  %v3172_v51 = vld [vmem:[%s4083_s30 + $0xd4] ss:$24 sps:$4 sm:$0xff]  }
 0x12e   : > { %1166 = vmatpush1.bf16.msra.mxu1 %v3130_v19  ;;  %1113 = vmatpush1.bf16.msra.mxu0 %v3135_v21  ;;  %v3170_v52 = vld [vmem:[%s4083_s30 + $0xd0] ss:$24 sps:$4 sm:$0xff]   ;;  %v3175_v53 = vld [vmem:[%s4083_s30 + $0x104] ss:$24 sps:$4 sm:$0xff]   ;;  %v3173_v54 = vld [vmem:[%s4083_s30 + $0x100] ss:$24 sps:$4 sm:$0xff]  }
 0x12f   : > { %1167 = vmatprep.subr.bf16.mxu1 %v3133_v20  ;;  %1114 = vmatprep.subr.bf16.mxu0 %v3137_v22  ;;  %v3178_v55 = vld [vmem:[%s4083_s30 + $0x134] ss:$24 sps:$4 sm:$0xff]   ;;  %v3176_v56 = vld [vmem:[%s4083_s30 + $0x130] ss:$24 sps:$4 sm:$0xff]   ;;  %v3181_v57 = vld [vmem:[%s4083_s30 + $0x164] ss:$24 sps:$4 sm:$0xff]  }
 0x130   : > { %v3179_v58 = vld [vmem:[%s4083_s30 + $0x160] ss:$24 sps:$4 sm:$0xff]   ;;  %v846_v62 = vsub.s32 2, %v4228_v61  ;;  %v838_v63 = vsub.s32 0, %v4228_v61  ;;  %v850_v1 = vsub.s32 3, %v4228_v61  ;;  %v842_v2 = vsub.s32 1, %v4228_v61 }
 0x131   : > { %v834_v0 = vld [vmem:[%s4089_s11] sm:$0x3f]  ;;  %vm1359_vm1 = vcmask 130048   ;;  %s4646_s29 = sld [smem:[#allocation42_spill]]  ;;  %s4648_s30 = sld [smem:[#allocation43_spill]] }
 0x132   : > { %1168 = vmatpush1.bf16.msra.mxu1 %v3136_v23  ;;  %1115 = vmatpush1.bf16.msra.mxu0 %v3141_v25  ;;  %v847_v3 = vrot.slane %v834_v0, %v846_v62  ;;  %v839_v4 = vrot.slane %v834_v0, %v838_v63  ;;  %v851_v7 = vrot.slane %v834_v0, %v850_v1  ;;  %s4654_s15 = sld [smem:[#allocation26_spill]]  ;;  %s4655_s1 = sld [smem:[#allocation51_spill]] }
 0x133   : > { %1169 = vmatprep.subr.bf16.mxu1 %v3139_v24  ;;  %1116 = vmatprep.subr.bf16.mxu0 %v3143_v26  ;;  %v843_v8 = vrot.slane %v834_v0, %v842_v2  ;;  %s2411_s14 = scalar_lea.sflag [#allocation5], %s4069_s0  ;;  %p4656_p1 = scmp.ne.s32.totalorder %s4617_s21, 0 }
 0x134   : > { %s3617_s7 = smov [#allocation14]  }
 0x136   : > { %1170 = vmatpush1.bf16.msra.mxu1 %v3142_v27  ;;  %1117 = vmatpush1.bf16.msra.mxu0 %v3147_v29 }
 0x137   : > { %1171 = vmatprep.subr.bf16.mxu1 %v3145_v28  ;;  %1118 = vmatprep.subr.bf16.mxu0 %v3149_v30  ;;  %s4647_s8 = scalar_lea.vmem %s4646_s29, %s4107_s3  ;;  %s4649_s11 = scalar_lea.vmem %s4648_s30, %s4107_s3 }
 0x138   : > { %s2425_s3 = sshll.u32 %s4141_s6, 4  ;;  %s3470_s29 = sshll.u32 %s3617_s7, 4  ;;  %s4461_s3 = int_to_ptr.vmem [resolvable:$true] %s2425_s3  ;;  %s3471_s29 = int_to_ptr.vmem [resolvable:$false] %s3470_s29 }
 0x139   : > { %s3466_s2 = scalar_lea.vmem %s4461_s3, 512  ;;  %p3473_p7 = scmp.lt.s32.totalorder %s4461_s3, %s3471_s29 }
 0x13a   : > { %1172 = vmatpush1.bf16.msra.mxu1 %v3148_v31  ;;  %1119 = vmatpush1.bf16.msra.mxu0 %v3153_v33  ;;  %p3467_p9 = scmp.ne.s32.totalorder %s4461_s3, %s3466_s2 }
 0x13b   : > { %1173 = vmatprep.subr.bf16.mxu1 %v3151_v32  ;;  %1120 = vmatprep.subr.bf16.mxu0 %v3155_v35 }
 0x13c   : > { %p3468_p10 = pnand %p3467_p9, %p4656_p1 }
 0x13e   : > { %1174 = vmatpush1.bf16.msra.mxu1 %v3154_v34  ;;  %1121 = vmatpush1.bf16.msra.mxu0 %v3157_v39  ;;  %p3469_p6 = pneg %p3468_p10 }
 0x13f   : > { %2950 = vmatprep.subr.bf16.mxu1 %v3160_v38  ;;  %1212 = vmatprep.subr.bf16.mxu0 %v3160_v38 }
 0x141   : > { %1192 = vmatmul.mubr.bf16.vlgmr.msra.gmra.mrb[0].mxu1 %v784_v40  ;;  %1139 = vmatmul.mubr.bf16.vlgmr.msra.gmra.mrb[0].mxu0 %v784_v40 }
 0x142   : > { %1201 = vmatprep.mubr.bf16.mxu1 %v3614_v6  ;;  %2958 = vmatpush1.bf16.msra.mxu1 %v3158_v41 }
 0x143   : > { %2951 = vmatprep.subr.bf16.mxu1 %v3163_v42  ;;  %1148 = vmatprep.mubr.bf16.mxu0 %v3614_v6 }
 0x144   : > { %1213 = vmatpush1.bf16.msra.mxu0 %v3158_v41 }
 0x145   : > { %1214 = vmatprep.subr.bf16.mxu0 %v3163_v42 }
 0x146   : > { %2959 = vmatpush1.bf16.msra.mxu1 %v3161_v45 }
 0x147   : > { %2952 = vmatprep.subr.bf16.mxu1 %v3166_v46 }
 0x148   : > { %1215 = vmatpush1.bf16.msra.mxu0 %v3161_v45 }
 0x149   : > { %1202 = vmatmul.mubr.bf16.gmra.mrb[4].mxu1 %v785_v48  ;;  %1216 = vmatprep.subr.bf16.mxu0 %v3166_v46 }
 0x14a   : > { %2960 = vmatpush1.bf16.msra.mxu1 %v3164_v47  ;;  %1254 = vmatprep.mubr.bf16.mxu1 %v3614_v6 }
 0x14b   : > { %1149 = vmatmul.mubr.bf16.gmra.mrb[4].mxu0 %v785_v48  ;;  %2953 = vmatprep.subr.bf16.mxu1 %v3169_v49 }
 0x14c   : > { %1217 = vmatpush1.bf16.msra.mxu0 %v3164_v47  ;;  %1244 = vmatprep.mubr.bf16.mxu0 %v3614_v6 }
 0x14d   : > { %1218 = vmatprep.subr.bf16.mxu0 %v3169_v49 }
 0x14e   : > { %2961 = vmatpush1.bf16.msra.mxu1 %v3167_v50 }
 0x14f   : > { %2954 = vmatprep.subr.bf16.mxu1 %v3172_v51 }
 0x150   : > { %1219 = vmatpush1.bf16.msra.mxu0 %v3167_v50 }
 0x151   : > { %1220 = vmatprep.subr.bf16.mxu0 %v3172_v51 }
 0x152   : > { %2962 = vmatpush1.bf16.msra.mxu1 %v3170_v52 }
 0x153   : > { %2955 = vmatprep.subr.bf16.mxu1 %v3175_v53 }
 0x154   : > { %1221 = vmatpush1.bf16.msra.mxu0 %v3170_v52  ;;  %v854_v52 = vsub.s32 4, %v4228_v61 }
 0x155   : > { %1222 = vmatprep.subr.bf16.mxu0 %v3175_v53  ;;  %v858_v53 = vsub.s32 5, %v4228_v61 }
 0x156   : > { %2963 = vmatpush1.bf16.msra.mxu1 %v3173_v54 }
 0x157   : > { %2956 = vmatprep.subr.bf16.mxu1 %v3178_v55 }
 0x158   : > { %1223 = vmatpush1.bf16.msra.mxu0 %v3173_v54  ;;  %v855_v54 = vrot.slane %v834_v0, %v854_v52 }
 0x159   : > { %1224 = vmatprep.subr.bf16.mxu0 %v3178_v55  ;;  %v859_v55 = vrot.slane %v834_v0, %v858_v53 }
 0x15a   : > { %2964 = vmatpush1.bf16.msra.mxu1 %v3176_v56 }
 0x15b   : > { %2957 = vmatprep.subr.bf16.mxu1 %v3181_v57 }
 0x15c   : > { %1225 = vmatpush1.bf16.msra.mxu0 %v3176_v56 }
 0x15d   : > { %1226 = vmatprep.subr.bf16.mxu0 %v3181_v57 }
 0x15e   : > { %2965 = vmatpush1.bf16.msra.mxu1 %v3179_v58 }
 0x15f   : > { %2902 = vmatprep.subr.bf16.mxu1 %v3615_v59 }
 0x160   : > { %1227 = vmatpush1.bf16.msra.mxu0 %v3179_v58 }
 0x161   : > { %1255 = vmatmul.mubr.bf16.vlgmr.msra.gmra.mrb[8].mxu1 %v785_v48  ;;  %2926 = vmatprep.subr.bf16.mxu0 %v3615_v59 }
 0x162   : > { %2904 = vmatprep.mubr.msk.bf16.mxu1 %vm3616_vm0, %v3615_v59 }
 0x163   : > { %1245 = vmatmul.mubr.bf16.vlgmr.msra.gmra.mrb[8].mxu0 %v784_v40 }
 0x164   : > { %2928 = vmatprep.mubr.msk.bf16.mxu0 %vm3616_vm0, %v3615_v59 }
 0x214   : > { %v1193_v5 = vpop.f32.mrb[0].mxu1  ;;  %v1140_v11 = vpop.f32.mrb[0].mxu0 }
 0x215   : > { %v1195_v9 = vpop.f32.mrb[1].mxu1  ;;  %v1194_v12 = vadd.f32 %v1193_v5, %v847_v3  ;;  %v1141_v15 = vadd.f32 %v1140_v11, %v839_v4  ;;  %v1142_v16 = vpop.f32.mrb[1].mxu0 }
 0x216   : > { %v1197_v10 = vpop.f32.mrb[2].mxu1  ;;  %v1196_v17 = vadd.f32 %v1195_v9, %v851_v7  ;;  %v1143_v19 = vadd.f32 %v1142_v16, %v843_v8  ;;  %v1144_v20 = vpop.f32.mrb[2].mxu0 }
 0x217   : > { %v1198_v13 = vadd.f32 %v1197_v10, %v847_v3  ;;  %v1199_v14 = vpop.f32.mrb[3].mxu1  ;;  %v1145_v22 = vadd.f32 %v1144_v20, %v839_v4  ;;  %v1146_v23 = vpop.f32.mrb[3].mxu0 }
 0x218   : > { %v1200_v18 = vadd.f32 %v1199_v14, %v851_v7  ;;  %v1147_v25 = vadd.f32 %v1146_v23, %v843_v8 }
 0x219   : > { %v1267_v21 = vpack.c.bf16 %v1198_v13, %v1194_v12  ;;  %v1265_v26 = vpack.c.bf16 %v1145_v22, %v1141_v15 }
 0x21a   : > { %v1268_v24 = vpack.c.bf16 %v1200_v18, %v1196_v17  ;;  %v1266_v27 = vpack.c.bf16 %v1147_v25, %v1143_v19 }
 0x21b   : > { %2903 = vmatpush3.bf16.xpose.msra.mxu1 %v1267_v21 }
 0x21c   : > { %v1203_v28 = vpop.f32.mrb[4].mxu1  ;;  %2927 = vmatpush3.bf16.xpose.msra.mxu0 %v1268_v24  ;;  %2908 = vmatprep.subr.bf16.mxu1 %v3615_v59 }
 0x21d   : > { %v1205_v29 = vpop.f32.mrb[5].mxu1  ;;  %2938 = vmatprep.subr.bf16.mxu0 %v3615_v59  ;;  %v1204_v33 = vadd.f32 %v1203_v28, %v847_v3 }
 0x21e   : > { %v4241_v30 = vadd.f32 %v1205_v29, %v851_v7  ;;  %v1207_v31 = vpop.f32.mrb[6].mxu1  ;;  %v1150_v32 = vpop.f32.mrb[4].mxu0 }
 0x21f   : > { %v1208_v34 = vadd.f32 %v1207_v31, %v847_v3  ;;  %v1209_v35 = vpop.f32.mrb[7].mxu1  ;;  %v1151_v38 = vadd.f32 %v1150_v32, %v839_v4  ;;  %v1152_v39 = vpop.f32.mrb[5].mxu0 }
 0x220   : > { %v4243_v40 = vadd.f32 %v1209_v35, %v851_v7  ;;  %v4245_v41 = vadd.f32 %v1152_v39, %v843_v8  ;;  %v1154_v42 = vpop.f32.mrb[6].mxu0 }
 0x221   : > { %v1273_v45 = vpack.c.bf16 %v1208_v34, %v1204_v33  ;;  %v1155_v46 = vadd.f32 %v1154_v42, %v839_v4  ;;  %v1156_v47 = vpop.f32.mrb[7].mxu0 }
 0x222   : > { %v1274_v48 = vpack.c.bf16 %v4243_v40, %v4241_v30  ;;  %2905 = vmatmul.mubr.bf16.vlgmr.msra.gmra.mrb[12].mxu1 %v1265_v26  ;;  %v4249_v49 = vadd.f32 %v1156_v47, %v843_v8 }
 0x223   : > { %v1271_v50 = vpack.c.bf16 %v1155_v46, %v1151_v38  ;;  %2909 = vmatpush3.bf16.xpose.msra.mxu1 %v1273_v45  ;;  %2929 = vmatmul.mubr.bf16.vlgmr.msra.gmra.mrb[12].mxu0 %v1266_v27 }
 0x224   : > { %v1272_v51 = vpack.c.bf16 %v4249_v49, %v4245_v41  ;;  %2910 = vmatprep.mubr.msk.bf16.mxu1 %vm3616_vm0, %v3615_v59  ;;  %2914 = vmatprep.subr.bf16.mxu1 %v3615_v59 }
 0x225   : > { %2940 = vmatprep.mubr.msk.bf16.mxu0 %vm3616_vm0, %v3615_v59 }
 0x22a   : > { %2911 = vmatmul.mubr.bf16.vlgmr.msra.gmra.mrb[16].mxu1 %v1271_v50 }
 0x22b   : > { %2916 = vmatprep.mubr.msk.bf16.mxu1 %vm3616_vm0, %v3615_v59 }
 0x234   : > { %v1256_v56 = vpop.f32.mrb[8].mxu1 }
 0x235   : > { %v4262_v57 = vadd.f32 %v1256_v56, %v855_v54  ;;  %v1258_v58 = vpop.f32.mrb[9].mxu1 }
 0x236   : > { %v4264_v60 = vadd.f32 %v1258_v58, %v859_v55  ;;  %v1260_v62 = vpop.f32.mrb[10].mxu1  ;;  %v1246_v1 = vpop.f32.mrb[8].mxu0 }
 0x237   : > { %v4266_v3 = vadd.f32 %v1260_v62, %v855_v54  ;;  %v1262_v4 = vpop.f32.mrb[11].mxu1  ;;  %v1247_v5 = vadd.f32 %v1246_v1, %v855_v54  ;;  %v1248_v7 = vpop.f32.mrb[9].mxu0 }
 0x238   : > { %v4268_v8 = vadd.f32 %v1262_v4, %v859_v55  ;;  %v1249_v9 = vadd.f32 %v1248_v7, %v859_v55  ;;  %v1250_v10 = vpop.f32.mrb[10].mxu0 }
 0x239   : > { %v1275_v0 = vpack.c.bf16 %v4266_v3, %v4262_v57  ;;  %v1251_v11 = vadd.f32 %v1250_v10, %v855_v54  ;;  %v1252_v12 = vpop.f32.mrb[11].mxu0 }
 0x23a   : > { %v1276_v13 = vpack.c.bf16 %v4268_v8, %v4264_v60  ;;  %v1253_v14 = vadd.f32 %v1252_v12, %v859_v55 }
 0x23b   : > { %v1269_v15 = vpack.c.bf16 %v1251_v11, %v1247_v5 }
 0x23c   : > { %v1270_v16 = vpack.c.bf16 %v1253_v14, %v1249_v9 }
 0x23d   : > { %2915 = vmatpush3.bf16.msra.mxu1 %v1269_v15 }
 0x23e   : > { %2939 = vmatpush3.bf16.msra.mxu0 %v1270_v16  ;;  %2920 = vmatprep.subr.bf16.mxu1 %v3615_v59 }
 0x2f5   : > { %v1311_v17 = vpop.f32.mrb[12].mxu1 }
 0x2f6   : > { %v2906_v18 = vpop.f32.mrb[13].mxu1  ;;  %v4275_v19 = vpop.f32.mrb[12].mxu0  ;;  %v1360_v20 = vsel %vm1359_vm1, %v1311_v17, -inf }
 0x2f7   : > { %v2930_v21 = vpop.f32.mrb[13].mxu0  ;;  %1361 = vmax.xlane.f32.xlu0 %v1360_v20  ;;  %v1314_v22 = vpop.f32.mrb[14].mxu1  ;;  %v1580_v7 = vsel %vm1359_vm1, %v4275_v19, -inf }
 0x2f8   : > { %v2907_v23 = vpop.f32.mrb[15].mxu1  ;;  %v4278_v24 = vpop.f32.mrb[14].mxu0  ;;  %v1363_v26 = vsel %vm1359_vm1, %v1314_v22, -inf }
 0x2f9   : > { %v2931_v25 = vpop.f32.mrb[15].mxu0  ;;  %v1583_v10 = vsel %vm1359_vm1, %v4278_v24, -inf }
 0x2fb   : > { %1364 = vmax.xlane.f32.xlu0 %v1363_v26 }
 0x2fd   : > { %v1352_v27 = vpop.f32.mrb[16].mxu1 }
 0x2fe   : > { %v2912_v28 = vpop.f32.mrb[17].mxu1  ;;  %v1366_v29 = vsel %vm1359_vm1, %v1352_v27, -inf }
 0x2ff   : > { %1367 = vmax.xlane.f32.xlu1 %v1366_v29  ;;  %v1355_v31 = vpop.f32.mrb[18].mxu1 }
 0x300   : > { %v2913_v32 = vpop.f32.mrb[19].mxu1  ;;  %v1369_v33 = vsel %vm1359_vm1, %v1355_v31, -inf }
 0x303   : > { %1370 = vmax.xlane.f32.xlu1 %v1369_v33 }
 0x384   : > { %v1362_v34 = vpop.xlane.xlu0 %1361 }
 0x385   : > { %v1372_v35 = vsub.f32 %v1311_v17, %v1362_v34 }
 0x387   : > { %v1376_v38 = vmul.f32 1.442695, %v1372_v35 }
 0x388   : > { %v1365_v39 = vpop.xlane.xlu0 %1364 }
 0x389   : > { %3238 = vpow2.f32 %v1376_v38  ;;  %v1373_v42 = vsub.f32 %v1314_v22, %v1365_v39 }
 0x38b   : > { %v1378_v45 = vmul.f32 1.442695, %v1373_v42 }
 0x38c   : > { %v1368_v46 = vpop.xlane.xlu1 %1367 }
 0x38d   : > { %3240 = vpow2.f32 %v1378_v45  ;;  %v1374_v47 = vsub.f32 %v1352_v27, %v1368_v46 }
 0x38f   : > { %v1380_v50 = vmul.f32 1.442695, %v1374_v47 }
 0x390   : > { %v1371_v52 = vpop.xlane.xlu1 %1370 }
 0x391   : > { %3242 = vpow2.f32 %v1380_v50  ;;  %v1375_v53 = vsub.f32 %v1355_v31, %v1371_v52 }
 0x393   : > { %v3239_v54 = vpop.eup %3238  ;;  %v1382_v55 = vmul.f32 1.442695, %v1375_v53 }
 0x394   : > { %v1384_v56 = vsel %vm1359_vm1, %v3239_v54, 0.0 }
 0x395   : > { %3244 = vpow2.f32 %v1382_v55  ;;  %1385 = vadd.xlane.f32.xlu0 %v1384_v56 }
 0x397   : > { %v3241_v58 = vpop.eup %3240 }
 0x398   : > { %v1387_v62 = vsel %vm1359_vm1, %v3241_v58, 0.0 }
 0x399   : > { %1388 = vadd.xlane.f32.xlu1 %v1387_v62 }
 0x39b   : > { %v3243_v1 = vpop.eup %3242 }
 0x39c   : > { %v1390_v4 = vsel %vm1359_vm1, %v3243_v1, 0.0 }
 0x39d   : > { %1391 = vadd.xlane.f32.xlu0 %v1390_v4 }
 0x39f   : > { %v3245_v5 = vpop.eup %3244 }
 0x3a0   : > { %v1393_v9 = vsel %vm1359_vm1, %v3245_v5, 0.0 }
 0x3a1   : > { %1581 = vmax.xlane.f32.xlu0 %v1580_v7  ;;  %1394 = vadd.xlane.f32.xlu1 %v1393_v9 }
 0x3a5   : > { %1584 = vmax.xlane.f32.xlu1 %v1583_v10 }
 0x422   : > { %v1386_v11 = vpop.xlane.xlu0 %1385 }
 0x423   : > { %3246 = vrcp.f32 %v1386_v11 }
 0x426   : > { %v1389_v12 = vpop.xlane.xlu1 %1388 }
 0x427   : > { %3248 = vrcp.f32 %v1389_v12  ;;  %v3182_v12 = vld [vmem:[%s4091_s5 + $0x40] sm:$0xff]  }
 0x428   : > { %2846 = vmatprep.subr.bf16.mxu0 %v3182_v12 }
 0x42a   : > { %v1392_v14 = vpop.xlane.xlu0 %1391 }
 0x42b   : > { %3250 = vrcp.f32 %v1392_v14  ;;  %v3183_v14 = vld [vmem:[%s4091_s5] sm:$0xff]  }
 0x42d   : > { %v3247_v16 = vpop.eup %3246 }
 0x42e   : > { %v1395_v15 = vpop.xlane.xlu1 %1394  ;;  %v1397_v18 = vmul.f32 %v3247_v16, %v3239_v54  ;;  %v1582_v57 = vpop.xlane.xlu0 %1581  ;;  %v3185_v16 = vld [vmem:[%s4091_s5 + $0x8] sm:$0xff]  }
 0x42f   : > { %3252 = vrcp.f32 %v1395_v15  ;;  %v1592_v30 = vsub.f32 %v4275_v19, %v1582_v57  ;;  %v3184_v15 = vld [vmem:[%s4091_s5 + $0x48] sm:$0xff]   ;;  %v3195_v57 = vld [vmem:[%s4091_s5 + $0x30] sm:$0xff]  }
 0x431   : > { %v3249_v17 = vpop.eup %3248 }
 0x432   : > { %v1399_v20 = vmul.f32 %v3249_v17, %v3241_v58  ;;  %v1585_v3 = vpop.xlane.xlu1 %1584  ;;  %v3186_v17 = vld [vmem:[%s4091_s5 + $0x50] sm:$0xff]  }
 0x433   : > { %v1593_v28 = vsub.f32 %v4278_v24, %v1585_v3  ;;  %v3196_v3 = vld [vmem:[%s4091_s5 + $0x78] sm:$0xff]  }
 0x434   : > { %v1404_v21 = vpack.c.bf16 %v1399_v20, %v1397_v18  ;;  %v3187_v18 = vld [vmem:[%s4091_s5 + $0x10] sm:$0xff]   ;;  %v3188_v20 = vld [vmem:[%s4091_s5 + $0x58] sm:$0xff]  }
 0x435   : > { %v3251_v22 = vpop.eup %3250  ;;  %v1598_v60 = vmul.f32 1.442695, %v1593_v28 }
 0x436   : > { %2917 = vmatmul.mubr.msk.bf16.vlgmr.msra.gmra.mrb[20].mxu1 %vm1359_vm1, %v1404_v21  ;;  %v1401_v25 = vmul.f32 %v3251_v22, %v3243_v1  ;;  %v3189_v21 = vld [vmem:[%s4091_s5 + $0x18] sm:$0xff]   ;;  %v3190_v22 = vld [vmem:[%s4091_s5 + $0x60] sm:$0xff]  }
 0x437   : > { %2921 = vmatpush3.bf16.msra.mxu1 %v1275_v0  ;;  %2922 = vmatprep.mubr.msk.bf16.mxu1 %vm3616_vm0, %v3615_v59 }
 0x438   : > { %2932 = vmatprep.subr.bf16.mxu1 %v3615_v59 }
 0x439   : > { %v3253_v23 = vpop.eup %3252 }
 0x43a   : > { %v1403_v26 = vmul.f32 %v3253_v23, %v3245_v5  ;;  %v3191_v23 = vld [vmem:[%s4091_s5 + $0x20] sm:$0xff]  }
 0x43c   : > { %v1405_v27 = vpack.c.bf16 %v1403_v26, %v1401_v25  ;;  %v3192_v25 = vld [vmem:[%s4091_s5 + $0x68] sm:$0xff]  }
 0x43d   : > { %v3193_v26 = vld [vmem:[%s4091_s5 + $0x28] sm:$0xff]  }
 0x43e   : > { %2923 = vmatmul.mubr.msk.bf16.vlgmr.msra.gmra.mrb[24].mxu1 %vm1359_vm1, %v1405_v27  ;;  %v3194_v27 = vld [vmem:[%s4091_s5 + $0x70] sm:$0xff]  }
 0x43f   : > { %2934 = vmatprep.mubr.msk.bf16.mxu1 %vm3616_vm0, %v3615_v59 }
 0x440   : > { %2933 = vmatpush3.bf16.xpose.msra.mxu1 %v1274_v48 }
 0x441   : > { %2944 = vmatprep.subr.bf16.mxu1 %v3615_v59 }
 0x447   : > { %2935 = vmatmul.mubr.bf16.vlgmr.msra.gmra.mrb[28].mxu1 %v1272_v51  ;;  %v1596_v51 = vmul.f32 1.442695, %v1592_v30  ;;  %v3197_v30 = vld [vmem:[%s4091_s5 + $0x38] sm:$0xff]  }
 0x448   : > { %2945 = vmatpush3.bf16.msra.mxu1 %v1276_v13  ;;  %2946 = vmatprep.mubr.msk.bf16.mxu1 %vm3616_vm0, %v3615_v59 }
 0x449   : > { %3254 = vpow2.f32 %v1596_v51 }
 0x44a   : > { %3256 = vpow2.f32 %v1598_v60 }
 0x453   : > { %v3255_v33 = vpop.eup %3254 }
 0x454   : > { %v3257_v39 = vpop.eup %3256  ;;  %v1604_v42 = vsel %vm1359_vm1, %v3255_v33, 0.0 }
 0x455   : > { %v1607_v45 = vsel %vm1359_vm1, %v3257_v39, 0.0 }
 0x509   : > { %v4313_v0 = vpop.f32.mrb[20].mxu1 }
 0x50a   : > { %v2918_v40 = vpop.f32.mrb[21].mxu1 }
 0x50b   : > { %v4316_v48 = vpop.f32.mrb[22].mxu1 }
 0x50c   : > { %v1494_v41 = vpack.c.bf16 %v4316_v48, %v4313_v0  ;;  %v2919_v49 = vpop.f32.mrb[23].mxu1 }
 0x511   : > { %v4321_v8 = vpop.f32.mrb[24].mxu1 }
 0x512   : > { %v2924_v59 = vpop.f32.mrb[25].mxu1 }
 0x513   : > { %v4323_v13 = vpop.f32.mrb[26].mxu1 }
 0x514   : > { %v1495_v19 = vpack.c.bf16 %v4323_v13, %v4321_v8  ;;  %v2925_v29 = vpop.f32.mrb[27].mxu1  ;;  %v3198_v13 = vld [vmem:[%s4097_s23] ss:$8 sps:$4 sm:$0xff]  }
 0x51a   : > { %v1573_v31 = vpop.f32.mrb[28].mxu1 }
 0x51b   : > { %v2936_v32 = vpop.f32.mrb[29].mxu1  ;;  %v1586_v24 = vsel %vm1359_vm1, %v1573_v31, -inf }
 0x51c   : > { %1587 = vmax.xlane.f32.xlu0 %v1586_v24  ;;  %v1576_v34 = vpop.f32.mrb[30].mxu1 }
 0x51d   : > { %v2937_v35 = vpop.f32.mrb[31].mxu1  ;;  %v1589_v38 = vsel %vm1359_vm1, %v1576_v34, -inf }
 0x51e   : > { %1590 = vmax.xlane.f32.xlu1 %v1589_v38 }
 0x520   : > { %1605 = vadd.xlane.f32.xlu0 %v1604_v42 }
 0x522   : > { %1608 = vadd.xlane.f32.xlu1 %v1607_v45 }
 0x5a9   : > { %v1588_v46 = vpop.xlane.xlu0 %1587 }
 0x5aa   : > { %v1594_v47 = vsub.f32 %v1573_v31, %v1588_v46 }
 0x5ab   : > { %v1591_v50 = vpop.xlane.xlu1 %1590 }
 0x5ac   : > { %v1600_v52 = vmul.f32 1.442695, %v1594_v47  ;;  %v1595_v53 = vsub.f32 %v1576_v34, %v1591_v50  ;;  %v2763_v47 = vld [vmem:[%s4647_s8] ss:$0 sm:$0xff]  ;;  %s3472_s8 = scalar_lea.vmem %s3471_s29, 1024 }
 0x5ad   : > { %v1606_v54 = vpop.xlane.xlu0 %1605  ;;  %p3474_p4 = scmp.lt.s32.totalorder %s3472_s8, %s3466_s2 }
 0x5ae   : > { %3258 = vpow2.f32 %v1600_v52  ;;  %v1602_v55 = vmul.f32 1.442695, %v1595_v53 }
 0x5af   : > { %3260 = vrcp.f32 %v1606_v54  ;;  %v1609_v56 = vpop.xlane.xlu1 %1608  ;;  %p3475_p3 = por %p3474_p4, %p3473_p7 }
 0x5b0   : > { %3262 = vpow2.f32 %v1602_v55 }
 0x5b1   : > { %3264 = vrcp.f32 %v1609_v56  ;;  %p3476_p12 = pnand %p3475_p3, %p3469_p6 }
 0x5b8   : > { %v3259_v58 = vpop.eup %3258 }
 0x5b9   : > { %v3261_v62 = vpop.eup %3260  ;;  %v1610_v1 = vsel %vm1359_vm1, %v3259_v58, 0.0 }
 0x5ba   : > { %v3263_v4 = vpop.eup %3262  ;;  %1611 = vadd.xlane.f32.xlu0 %v1610_v1  ;;  %v1617_v9 = vmul.f32 %v3261_v62, %v3255_v33 }
 0x5bb   : > { %v3265_v5 = vpop.eup %3264  ;;  %v1613_v7 = vsel %vm1359_vm1, %v3263_v4, 0.0 }
 0x5bc   : > { %v1619_v10 = vmul.f32 %v3265_v5, %v3257_v39  ;;  %1614 = vadd.xlane.f32.xlu1 %v1613_v7 }
 0x5be   : > { %v1624_v11 = vpack.c.bf16 %v1619_v10, %v1617_v9 }
 0x5c0   : > { %2941 = vmatmul.mubr.msk.bf16.vlgmr.msra.gmra.mrb[16].mxu0 %vm1359_vm1, %v1624_v11 }
 0x5c1   : > { %2847 = vmatpush3.bf16.msra.mxu0 %v3183_v14 }
 0x5c2   : > { %2848 = vmatprep.subr.bf16.mxu0 %v3184_v15 }
 0x5c5   : > { %2849 = vmatpush3.bf16.msra.mxu0 %v3185_v16 }
 0x5c6   : > { %2850 = vmatprep.subr.bf16.mxu0 %v3186_v17 }
 0x5c9   : > { %2851 = vmatpush3.bf16.msra.mxu0 %v3187_v18 }
 0x5ca   : > { %2852 = vmatprep.subr.bf16.mxu0 %v3188_v20  ;;  %v3203_v20 = vld [vmem:[%s4097_s23 + $0x14] ss:$8 sps:$4 sm:$0xff]  }
 0x5cd   : > { %2853 = vmatpush3.bf16.msra.mxu0 %v3189_v21  ;;  %v3201_v21 = vld [vmem:[%s4097_s23 + $0x10] ss:$8 sps:$4 sm:$0xff]  }
 0x5ce   : > { %2854 = vmatprep.subr.bf16.mxu0 %v3190_v22  ;;  %v3204_v22 = vld [vmem:[%s4097_s23 + $0x20] ss:$8 sps:$4 sm:$0xff]  }
 0x5d1   : > { %2855 = vmatpush3.bf16.msra.mxu0 %v3191_v23  ;;  %v3207_v23 = vld [vmem:[%s4097_s23 + $0x30] ss:$8 sps:$4 sm:$0xff]  }
 0x5d2   : > { %2856 = vmatprep.subr.bf16.mxu0 %v3192_v25  ;;  %v3212_v25 = vld [vmem:[%s4097_s23 + $0x44] ss:$8 sps:$4 sm:$0xff]  }
 0x5d5   : > { %2857 = vmatpush3.bf16.msra.mxu0 %v3193_v26  ;;  %v3210_v26 = vld [vmem:[%s4097_s23 + $0x40] ss:$8 sps:$4 sm:$0xff]  }
 0x5d6   : > { %2858 = vmatprep.subr.bf16.mxu0 %v3194_v27  ;;  %v3215_v27 = vld [vmem:[%s4097_s23 + $0x54] ss:$8 sps:$4 sm:$0xff]  }
 0x5d9   : > { %2859 = vmatpush3.bf16.msra.mxu0 %v3195_v57  ;;  %v3213_v57 = vld [vmem:[%s4097_s23 + $0x50] ss:$8 sps:$4 sm:$0xff]  }
 0x5da   : > { %2860 = vmatprep.subr.bf16.mxu0 %v3196_v3  ;;  %v3218_v3 = vld [vmem:[%s4097_s23 + $0x64] ss:$8 sps:$4 sm:$0xff]  }
 0x5dd   : > { %2861 = vmatpush3.bf16.msra.mxu0 %v3197_v30  ;;  %v3216_v30 = vld [vmem:[%s4097_s23 + $0x60] ss:$8 sps:$4 sm:$0xff]  }
 0x647   : > { %v1612_v40 = vpop.xlane.xlu0 %1611 }
 0x648   : > { %3266 = vrcp.f32 %v1612_v40  ;;  %v3221_v40 = vld [vmem:[%s4097_s23 + $0x74] ss:$8 sps:$4 sm:$0xff]  }
 0x649   : > { %v1615_v28 = vpop.xlane.xlu1 %1614 }
 0x64a   : > { %3268 = vrcp.f32 %v1615_v28  ;;  %v3219_v28 = vld [vmem:[%s4097_s23 + $0x70] ss:$8 sps:$4 sm:$0xff]  }
 0x652   : > { %v3267_v49 = vpop.eup %3266 }
 0x653   : > { %v1621_v60 = vmul.f32 %v3267_v49, %v3259_v58 }
 0x654   : > { %v3269_v51 = vpop.eup %3268 }
 0x655   : > { %v1623_v59 = vmul.f32 %v3269_v51, %v3263_v4 }
 0x657   : > { %v1625_v29 = vpack.c.bf16 %v1623_v59, %v1621_v60 }
 0x659   : > { %2947 = vmatmul.mubr.msk.bf16.vlgmr.msra.gmra.mrb[32].mxu1 %vm1359_vm1, %v1625_v29 }
 0x65a   : > { %2119 = vmatprep.mubr.bf16.mxu1 %v3614_v6 }
 0x693   : > { %v1663_v31 = vpop.f32.mrb[16].mxu0 }
 0x694   : > { %v2942_v32 = vpop.f32.mrb[17].mxu0 }
 0x695   : > { %v1666_v24 = vpop.f32.mrb[18].mxu0 }
 0x696   : > { %v1714_v33 = vpack.c.bf16 %v1666_v24, %v1663_v31  ;;  %v2943_v34 = vpop.f32.mrb[19].mxu0 }
 0x698   : > { %1889 = vmatprep.mubr.bf16.mxu0 %v1714_v33 }
 0x699   : > { %1890 = vmatmul.mubr.bf16.vlgmr.msra.gmra.mrb[20].mxu0 %v1494_v41 }
 0x72c   : > { %v1707_v35 = vpop.f32.mrb[32].mxu1 }
 0x72d   : > { %v2948_v38 = vpop.f32.mrb[33].mxu1 }
 0x72e   : > { %v1710_v39 = vpop.f32.mrb[34].mxu1 }
 0x72f   : > { %v1715_v42 = vpack.c.bf16 %v1710_v39, %v1707_v35  ;;  %v2949_v45 = vpop.f32.mrb[35].mxu1 }
 0x731   : > { %1897 = vmatprep.mubr.bf16.mxu0 %v1715_v42 }
 0x732   : > { %1898 = vmatmul.mubr.bf16.gmra.mrb[24].mxu0 %v1495_v19  ;;  %v3200_v19 = vld [vmem:[%s4097_s23 + $0x4] ss:$8 sps:$4 sm:$0xff]  }
 0x733   : > { %2087 = vmatprep.subr.bf16.mxu1 %v3200_v19  ;;  %v3224_v19 = vld [vmem:[%s4099_s17 + $0x48] sm:$0xff]  }
 0x734   : > { %2088 = vmatpush1.bf16.msra.mxu1 %v3198_v13  ;;  %v3223_v13 = vld [vmem:[%s4099_s17] sm:$0xff]  }
 0x735   : > { %2089 = vmatprep.subr.bf16.mxu1 %v3203_v20 }
 0x738   : > { %2090 = vmatpush1.bf16.msra.mxu1 %v3201_v21 }
 0x76c   : > { %v2862_v46 = vpop.f32.mrb[20].mxu0 }
 0x76d   : > { %v2863_v0 = vpop.f32.mrb[21].mxu0 }
 0x76e   : > { %v2864_v48 = vadd.f32 %v2863_v0, %v2862_v46  ;;  %v2865_v41 = vpop.f32.mrb[22].mxu0  ;;  %v2780_v46 = vld [vmem:[%s4649_s11] ss:$0 sm:$0xff] }
 0x76f   : > { %v2866_v50 = vpop.f32.mrb[23].mxu0 }
 0x770   : > { %v1892_v52 = vadd.f32 %v2864_v48, %v2763_v47  ;;  %v2867_v53 = vadd.f32 %v2866_v50, %v2865_v41  ;;  %v2781_v50 = vld [vmem:[%s752_s4] ss:$0 sm:$0xff] }
 0x772   : > { %v1895_v54 = vadd.f32 %v2867_v53, %v2763_v47  ;;  %v1906_v55 = vadd.f32 %v1892_v52, %v4186_v36 }
 0x774   : > { %1910 = vadd.xlane.f32.xlu0 %v1906_v55  ;;  %v1907_v8 = vadd.f32 %v1895_v54, %v4189_v37 }
 0x776   : > { %1912 = vadd.xlane.f32.xlu1 %v1907_v8 }
 0x801   : > { %v1911_v56 = vpop.xlane.xlu0 %1910 }
 0x802   : > { %v1919_v4 = vmul.f32 0.0078125, %v1911_v56  ;;  %v3225_v56 = vld [vmem:[%s4099_s17 + $0x8] sm:$0xff]  }
 0x803   : > { %v1913_v62 = vpop.xlane.xlu1 %1912 }
 0x804   : > { %v1920_v10 = vmul.f32 0.0078125, %v1913_v62  ;;  %v1923_v37 = vsub.f32 %v1906_v55, %v1919_v4  ;;  %v3227_v62 = vld [vmem:[%s4099_s17 + $0x10] sm:$0xff]   ;;  %v3230_v4 = vld [vmem:[%s4099_s17 + $0x60] sm:$0xff]  }
 0x805   : > { %v2868_v58 = vpop.f32.mrb[24].mxu0 }
 0x806   : > { %v2869_v1 = vpop.f32.mrb[25].mxu0  ;;  %v1924_v15 = vsub.f32 %v1907_v8, %v1920_v10  ;;  %v1927_v17 = vmul.f32 %v1923_v37, %v1923_v37  ;;  %v3222_v8 = vld [vmem:[%s4099_s17 + $0x40] sm:$0xff]   ;;  %v3234_v10 = vld [vmem:[%s4099_s17 + $0x70] sm:$0xff]  }
 0x807   : > { %v2870_v5 = vadd.f32 %v2869_v1, %v2868_v58  ;;  %v2871_v7 = vpop.f32.mrb[26].mxu0  ;;  %2874 = vmatprep.subr.bf16.mxu0 %v3222_v8  ;;  %v3226_v58 = vld [vmem:[%s4099_s17 + $0x50] sm:$0xff]   ;;  %v3228_v1 = vld [vmem:[%s4099_s17 + $0x58] sm:$0xff]  }
 0x808   : > { %v2872_v9 = vpop.f32.mrb[27].mxu0  ;;  %v1928_v18 = vmul.f32 %v1924_v15, %v1924_v15  ;;  %2875 = vmatpush3.bf16.msra.mxu0 %v3223_v13  ;;  %v2798_v13 = vld [vmem:[%s759_s16] ss:$0 sm:$0xff] }
 0x809   : > { %v1900_v36 = vadd.f32 %v2870_v5, %v2763_v47  ;;  %v2873_v11 = vadd.f32 %v2872_v9, %v2871_v7  ;;  %2876 = vmatprep.subr.bf16.mxu0 %v3224_v19  ;;  %v3231_v5 = vld [vmem:[%s4099_s17 + $0x20] sm:$0xff]   ;;  %v3232_v7 = vld [vmem:[%s4099_s17 + $0x68] sm:$0xff]  }
 0x80a   : > { %v3233_v9 = vld [vmem:[%s4099_s17 + $0x28] sm:$0xff]  }
 0x80b   : > { %v1903_v12 = vadd.f32 %v2873_v11, %v2763_v47  ;;  %v1908_v14 = vadd.f32 %v1900_v36, %v4198_v43  ;;  %v3206_v43 = vld [vmem:[%s4097_s23 + $0x24] ss:$8 sps:$4 sm:$0xff]   ;;  %v3235_v36 = vld [vmem:[%s4099_s17 + $0x30] sm:$0xff]   ;;  %v3236_v11 = vld [vmem:[%s4099_s17 + $0x78] sm:$0xff]  }
 0x80c   : > { %2091 = vmatprep.subr.bf16.mxu1 %v3206_v43  ;;  %2877 = vmatpush3.bf16.msra.mxu0 %v3225_v56 }
 0x80d   : > { %1914 = vadd.xlane.f32.xlu0 %v1908_v14  ;;  %v1909_v16 = vadd.f32 %v1903_v12, %v4201_v44  ;;  %2092 = vmatpush1.bf16.msra.mxu1 %v3204_v22  ;;  %v3209_v44 = vld [vmem:[%s4097_s23 + $0x34] ss:$8 sps:$4 sm:$0xff]  }
 0x80e   : > { %2093 = vmatprep.subr.bf16.mxu1 %v3209_v44  ;;  %2878 = vmatprep.subr.bf16.mxu0 %v3226_v58 }
 0x80f   : > { %1916 = vadd.xlane.f32.xlu1 %v1909_v16 }
 0x810   : > { %2879 = vmatpush3.bf16.msra.mxu0 %v3227_v62 }
 0x811   : > { %1931 = vadd.xlane.f32.xlu0 %v1927_v17  ;;  %2094 = vmatpush1.bf16.msra.mxu1 %v3207_v23 }
 0x812   : > { %2095 = vmatprep.subr.bf16.mxu1 %v3212_v25  ;;  %2880 = vmatprep.subr.bf16.mxu0 %v3228_v1 }
 0x813   : > { %1933 = vadd.xlane.f32.xlu1 %v1928_v18 }
 0x815   : > { %2096 = vmatpush1.bf16.msra.mxu1 %v3210_v26 }
 0x816   : > { %2097 = vmatprep.subr.bf16.mxu1 %v3215_v27 }
 0x819   : > { %2098 = vmatpush1.bf16.msra.mxu1 %v3213_v57  ;;  %v1995_v57 = vld [vmem:[%s4125_s26] sm:$0x3] }
 0x81a   : > { %2099 = vmatprep.subr.bf16.mxu1 %v3218_v3  ;;  %v2000_v3 = vrot.slane %v1995_v57, %v838_v63 }
 0x81d   : > { %2100 = vmatpush1.bf16.msra.mxu1 %v3216_v30  ;;  %v2004_v30 = vrot.slane %v1995_v57, %v842_v2 }
 0x81e   : > { %2101 = vmatprep.subr.bf16.mxu1 %v3221_v40 }
 0x821   : > { %2102 = vmatpush1.bf16.msra.mxu1 %v3219_v28 }
 0x89a   : > { %v1915_v49 = vpop.xlane.xlu0 %1914 }
 0x89b   : > { %v1921_v51 = vmul.f32 0.0078125, %v1915_v49 }
 0x89c   : > { %v1917_v60 = vpop.xlane.xlu1 %1916 }
 0x89d   : > { %v4383_v59 = vsub.f32 %v1908_v14, %v1921_v51  ;;  %v1922_v29 = vmul.f32 0.0078125, %v1917_v60 }
 0x89e   : > { %v1932_v31 = vpop.xlane.xlu0 %1931 }
 0x89f   : > { %v4385_v32 = vsub.f32 %v1909_v16, %v1922_v29  ;;  %v1939_v24 = vmul.f32 0.0078125, %v1932_v31  ;;  %v1929_v33 = vmul.f32 %v4383_v59, %v4383_v59 }
 0x8a0   : > { %v1934_v34 = vpop.xlane.xlu1 %1933 }
 0x8a1   : > { %v1943_v35 = vadd.f32 1e-05, %v1939_v24  ;;  %v1940_v38 = vmul.f32 0.0078125, %v1934_v34  ;;  %1935 = vadd.xlane.f32.xlu0 %v1929_v33  ;;  %v1930_v39 = vmul.f32 %v4385_v32, %v4385_v32 }
 0x8a3   : > { %3270 = vrsqrt.f32 %v1943_v35  ;;  %v1944_v42 = vadd.f32 1e-05, %v1940_v38  ;;  %1937 = vadd.xlane.f32.xlu1 %v1930_v39 }
 0x8a5   : > { %3272 = vrsqrt.f32 %v1944_v42 }
 0x8ad   : > { %v3271_v45 = vpop.eup %3270 }
 0x8ae   : > { %v1951_v47 = vmul.f32 %v3271_v45, %v1923_v37  ;;  %v3237_v37 = vld [vmem:[%s4099_s17 + $0x38] sm:$0xff]  }
 0x8af   : > { %v3273_v0 = vpop.eup %3272 }
 0x8b0   : > { %v1952_v48 = vmul.f32 %v3273_v0, %v1924_v15  ;;  %v1962_v41 = vmul.f32 %v2780_v46, %v1951_v47 }
 0x8b2   : > { %v1963_v52 = vmul.f32 %v2780_v46, %v1952_v48  ;;  %v4401_v53 = vadd.f32 %v2781_v50, %v1962_v41 }
 0x8b4   : > { %v4403_v54 = vadd.f32 %v2781_v50, %v1963_v52 }
 0x8b6   : > { %v1977_v55 = vpack.c.bf16 %v4403_v54, %v4401_v53 }
 0x8b8   : > { %2120 = vmatmul.mubr.bf16.vlgmr.msra.gmra.mrb[36].mxu1 %v1977_v55 }
 0x8b9   : > { %2129 = vmatprep.mubr.bf16.mxu1 %v3614_v6  ;;  %v3229_v6 = vld [vmem:[%s4099_s17 + $0x18] sm:$0xff]  }
 0x8ba   : > { %2881 = vmatpush3.bf16.msra.mxu0 %v3229_v6 }
 0x8bb   : > { %2882 = vmatprep.subr.bf16.mxu0 %v3230_v4 }
 0x8be   : > { %2883 = vmatpush3.bf16.msra.mxu0 %v3231_v5 }
 0x8bf   : > { %2884 = vmatprep.subr.bf16.mxu0 %v3232_v7 }
 0x8c2   : > { %2885 = vmatpush3.bf16.msra.mxu0 %v3233_v9 }
 0x8c3   : > { %2886 = vmatprep.subr.bf16.mxu0 %v3234_v10 }
 0x8c6   : > { %2887 = vmatpush3.bf16.msra.mxu0 %v3235_v36 }
 0x8c7   : > { %2888 = vmatprep.subr.bf16.mxu0 %v3236_v11 }
 0x8ca   : > { %2889 = vmatpush3.bf16.msra.mxu0 %v3237_v37 }
 0x92e   : > { %v1936_v12 = vpop.xlane.xlu0 %1935 }
 0x92f   : > { %v1941_v14 = vmul.f32 0.0078125, %v1936_v12 }
 0x930   : > { %v1938_v15 = vpop.xlane.xlu1 %1937 }
 0x931   : > { %v1945_v16 = vadd.f32 1e-05, %v1941_v14  ;;  %v1942_v17 = vmul.f32 0.0078125, %v1938_v15 }
 0x933   : > { %3274 = vrsqrt.f32 %v1945_v16  ;;  %v1946_v18 = vadd.f32 1e-05, %v1942_v17 }
 0x935   : > { %3276 = vrsqrt.f32 %v1946_v18 }
 0x93d   : > { %v3275_v20 = vpop.eup %3274 }
 0x93e   : > { %v1953_v21 = vmul.f32 %v3275_v20, %v4383_v59 }
 0x93f   : > { %v3277_v43 = vpop.eup %3276 }
 0x940   : > { %v1954_v22 = vmul.f32 %v3277_v43, %v4385_v32  ;;  %v1964_v44 = vmul.f32 %v2780_v46, %v1953_v21 }
 0x942   : > { %v1965_v23 = vmul.f32 %v2780_v46, %v1954_v22  ;;  %v1975_v25 = vadd.f32 %v2781_v50, %v1964_v44 }
 0x944   : > { %v4426_v26 = vadd.f32 %v2781_v50, %v1965_v23 }
 0x946   : > { %v1978_v27 = vpack.c.bf16 %v4426_v26, %v1975_v25 }
 0x948   : > { %2130 = vmatmul.mubr.bf16.gmra.mrb[40].mxu1 %v1978_v27 }
 0x98b   : > { %v2121_v40 = vpop.f32.mrb[36].mxu1 }
 0x98c   : > { %v2122_v28 = vadd.f32 %v2121_v40, %v2000_v3  ;;  %v2123_v49 = vpop.f32.mrb[37].mxu1 }
 0x98d   : > { %v2124_v51 = vadd.f32 %v2123_v49, %v2004_v30  ;;  %v2125_v60 = vpop.f32.mrb[38].mxu1 }
 0x98e   : > { %v2126_v59 = vadd.f32 %v2125_v60, %v2000_v3  ;;  %v2127_v29 = vpop.f32.mrb[39].mxu1  ;;  %v2140_v32 = vmax.f32 %v2122_v28, 0.0 }
 0x98f   : > { %v2128_v31 = vadd.f32 %v2127_v29, %v2004_v30  ;;  %v2141_v33 = vmax.f32 %v2124_v51, 0.0 }
 0x990   : > { %v2142_v24 = vmax.f32 %v2126_v59, 0.0 }
 0x991   : > { %v2143_v34 = vmax.f32 %v2128_v31, 0.0 }
 0x992   : > { %v2148_v35 = vpack.c.bf16 %v2142_v24, %v2140_v32  ;;  %v2815_v32 = vld [vmem:[%s762_s18] ss:$0 sm:$0xff]  ;;  %s2829_s18 = sshll.u32 %s4654_s15, 9 }
 0x993   : > { %v2149_v38 = vpack.c.bf16 %v2143_v34, %v2141_v33  ;;  %v2816_v34 = vld [vmem:[%s765_s20] ss:$0 sm:$0xff]  ;;  %s4459_s10 = scalar_lea.hbm %s4655_s1, %s2829_s18 }
 0x995   : > { %2319 = vmatprep.mubr.bf16.mxu0 %v2149_v38 }
 0x996   : > { %2320 = vmatmul.mubr.bf16.vlgmr.msra.gmra.mrb[28].mxu0 %v2148_v35 }
 0xa1b   : > { %v2131_v63 = vpop.f32.mrb[40].mxu1 }
 0xa1c   : > { %v2132_v39 = vadd.f32 %v2131_v63, %v2000_v3  ;;  %v2133_v61 = vpop.f32.mrb[41].mxu1 }
 0xa1d   : > { %v2134_v2 = vadd.f32 %v2133_v61, %v2004_v30  ;;  %v2135_v42 = vpop.f32.mrb[42].mxu1 }
 0xa1e   : > { %v2136_v45 = vadd.f32 %v2135_v42, %v2000_v3  ;;  %v2137_v46 = vpop.f32.mrb[43].mxu1  ;;  %v2144_v0 = vmax.f32 %v2132_v39, 0.0 }
 0xa1f   : > { %v2138_v47 = vadd.f32 %v2137_v46, %v2004_v30  ;;  %v2145_v41 = vmax.f32 %v2134_v2, 0.0 }
 0xa20   : > { %v2146_v48 = vmax.f32 %v2136_v45, 0.0 }
 0xa21   : > { %v2147_v50 = vmax.f32 %v2138_v47, 0.0 }
 0xa22   : > { %v2150_v52 = vpack.c.bf16 %v2146_v48, %v2144_v0 }
 0xa23   : > { %v2151_v55 = vpack.c.bf16 %v2147_v50, %v2145_v41 }
 0xa25   : > { %2327 = vmatprep.mubr.bf16.mxu0 %v2151_v55 }
 0xa26   : > { %2328 = vmatmul.mubr.bf16.gmra.mrb[32].mxu0 %v2150_v52 }
 0xa69   : > { %v2890_v8 = vpop.f32.mrb[28].mxu0 }
 0xa6a   : > { %v2891_v19 = vpop.f32.mrb[29].mxu0 }
 0xa6b   : > { %v2892_v56 = vadd.f32 %v2891_v19, %v2890_v8  ;;  %v2893_v58 = vpop.f32.mrb[30].mxu0 }
 0xa6c   : > { %v2894_v62 = vpop.f32.mrb[31].mxu0 }
 0xa6d   : > { %v2322_v1 = vadd.f32 %v2892_v56, %v2798_v13  ;;  %v2895_v6 = vadd.f32 %v2894_v62, %v2893_v58 }
 0xa6f   : > { %v2325_v4 = vadd.f32 %v2895_v6, %v2798_v13  ;;  %v2336_v5 = vadd.f32 %v2322_v1, %v4401_v53 }
 0xa71   : > { %2340 = vadd.xlane.f32.xlu0 %v2336_v5  ;;  %v2337_v7 = vadd.f32 %v2325_v4, %v4403_v54 }
 0xa73   : > { %2342 = vadd.xlane.f32.xlu1 %v2337_v7 }
 0xaf9   : > { %v2896_v9 = vpop.f32.mrb[32].mxu0 }
 0xafa   : > { %v2897_v10 = vpop.f32.mrb[33].mxu0 }
 0xafb   : > { %v2898_v36 = vadd.f32 %v2897_v10, %v2896_v9  ;;  %v2899_v11 = vpop.f32.mrb[34].mxu0 }
 0xafc   : > { %v2900_v37 = vpop.f32.mrb[35].mxu0 }
 0xafd   : > { %v2330_v12 = vadd.f32 %v2898_v36, %v2798_v13  ;;  %v2901_v14 = vadd.f32 %v2900_v37, %v2899_v11 }
 0xafe   : > { %v2341_v15 = vpop.xlane.xlu0 %2340 }
 0xaff   : > { %v2333_v16 = vadd.f32 %v2901_v14, %v2798_v13  ;;  %v2348_v17 = vmul.f32 0.0078125, %v2341_v15  ;;  %v2338_v18 = vadd.f32 %v2330_v12, %v1975_v25 }
 0xb00   : > { %v2343_v20 = vpop.xlane.xlu1 %2342 }
 0xb01   : > { %v2352_v21 = vsub.f32 %v2336_v5, %v2348_v17  ;;  %v2349_v43 = vmul.f32 0.0078125, %v2343_v20  ;;  %2344 = vadd.xlane.f32.xlu0 %v2338_v18  ;;  %v2339_v53 = vadd.f32 %v2333_v16, %v4426_v26 }
 0xb03   : > { %v2353_v22 = vsub.f32 %v2337_v7, %v2349_v43  ;;  %2346 = vadd.xlane.f32.xlu1 %v2339_v53  ;;  %v2356_v54 = vmul.f32 %v2352_v21, %v2352_v21 }
 0xb05   : > { %2360 = vadd.xlane.f32.xlu0 %v2356_v54  ;;  %v2357_v44 = vmul.f32 %v2353_v22, %v2353_v22 }
 0xb07   : > { %2362 = vadd.xlane.f32.xlu1 %v2357_v44 }
 0xb8e   : > { %v2345_v23 = vpop.xlane.xlu0 %2344 }
 0xb8f   : > { %v2350_v27 = vmul.f32 0.0078125, %v2345_v23 }
 0xb90   : > { %v2347_v57 = vpop.xlane.xlu1 %2346 }
 0xb91   : > { %v2354_v3 = vsub.f32 %v2338_v18, %v2350_v27  ;;  %v2351_v30 = vmul.f32 0.0078125, %v2347_v57 }
 0xb92   : > { %v2361_v40 = vpop.xlane.xlu0 %2360 }
 0xb93   : > { %v2355_v25 = vsub.f32 %v2339_v53, %v2351_v30  ;;  %v2368_v28 = vmul.f32 0.0078125, %v2361_v40  ;;  %v2358_v49 = vmul.f32 %v2354_v3, %v2354_v3 }
 0xb94   : > { %v2363_v51 = vpop.xlane.xlu1 %2362 }
 0xb95   : > { %v2372_v60 = vadd.f32 1e-05, %v2368_v28  ;;  %v2369_v26 = vmul.f32 0.0078125, %v2363_v51  ;;  %2364 = vadd.xlane.f32.xlu0 %v2358_v49  ;;  %v2359_v59 = vmul.f32 %v2355_v25, %v2355_v25 }
 0xb97   : > { %3278 = vrsqrt.f32 %v2372_v60  ;;  %v2373_v29 = vadd.f32 1e-05, %v2369_v26  ;;  %2366 = vadd.xlane.f32.xlu1 %v2359_v59 }
 0xb99   : > { %3280 = vrsqrt.f32 %v2373_v29 }
 0xba1   : > { %v3279_v31 = vpop.eup %3278 }
 0xba2   : > { %v2380_v24 = vmul.f32 %v3279_v31, %v2352_v21 }
 0xba3   : > { %v3281_v33 = vpop.eup %3280 }
 0xba4   : > { %v2391_v35 = vmul.f32 %v2815_v32, %v2380_v24  ;;  %v2381_v38 = vmul.f32 %v3281_v33, %v2353_v22 }
 0xba6   : > { %v2402_v63 = vadd.f32 %v2816_v34, %v2391_v35  ;;  %v2392_v39 = vmul.f32 %v2815_v32, %v2381_v38 }
 0xba8   : > { %2406 = vst [vmem:[%s4141_s6] sm:$0xff] %v2402_v63  ;;  %v2403_v61 = vadd.f32 %v2816_v34, %v2392_v39 }
 0xbaa   : > { %2407 = vst [vmem:[%s4141_s6 + $0x8] sm:$0xff] %v2403_v61 }
 0xc22   : > { %v2365_v2 = vpop.xlane.xlu0 %2364 }
 0xc23   : > { %v2370_v42 = vmul.f32 0.0078125, %v2365_v2 }
 0xc24   : > { %v2367_v45 = vpop.xlane.xlu1 %2366 }
 0xc25   : > { %v2374_v46 = vadd.f32 1e-05, %v2370_v42  ;;  %v2371_v47 = vmul.f32 0.0078125, %v2367_v45 }
 0xc27   : > { %3282 = vrsqrt.f32 %v2374_v46  ;;  %v2375_v0 = vadd.f32 1e-05, %v2371_v47 }
 0xc29   : > { %3284 = vrsqrt.f32 %v2375_v0 }
 0xc31   : > { %v3283_v48 = vpop.eup %3282 }
 0xc32   : > { %v2382_v41 = vmul.f32 %v3283_v48, %v2354_v3 }
 0xc33   : > { %v3285_v50 = vpop.eup %3284 }
 0xc34   : > { %v2393_v52 = vmul.f32 %v2815_v32, %v2382_v41  ;;  %v2383_v55 = vmul.f32 %v3285_v50, %v2355_v25 }
 0xc36   : > { %v2404_v8 = vadd.f32 %v2816_v34, %v2393_v52  ;;  %v2394_v13 = vmul.f32 %v2815_v32, %v2383_v55 }
 0xc38   : > { %2408 = vst [vmem:[%s4141_s6 + $0x10] sm:$0xff] %v2404_v8  ;;  %v2405_v19 = vadd.f32 %v2816_v34, %v2394_v13 }
 0xc3a   : > { %2409 = vst [vmem:[%s4141_s6 + $0x18] sm:$0xff] %v2405_v19 }
 0xc3b   : > { %3479 = shalt.err (!%p3476_p12)
}
 0xc3c   : > { %s3480_s6 = scalar_lea.hbm %s4459_s10, 512  ;;  %s3484_s30 = scalar_lea.hbm %s4655_s1, 1024 }
 0xc3d   : > { %p3481_p11 = scmp.ne.s32.totalorder %s4459_s10, %s3480_s6  ;;  %p3485_p13 = scmp.lt.u32.totalorder %s4459_s10, %s4655_s1 }
 0xc3e   : > { %p3486_p5 = scmp.lt.u32.totalorder %s3484_s30, %s3480_s6  ;;  %p3488_p9 = scmp.lt.u32.totalorder %s3480_s6, %s4459_s10 }
 0xc3f   : > { %p3482_p8 = pnand %p3481_p11, %p4656_p1 }
 0xc40   : > { %p3487_p0 = por %p3486_p5, %p3485_p13 }
 0xc41   : > { %p3483_p2 = pneg %p3482_p8 }
 0xc42   : > { %p3489_p10 = por %p3488_p9, %p3487_p0 }
 0xc44   : > { %p3490_p6 = pnand %p3489_p10, %p3483_p2 }
 0xc46   : > { %3493 = shalt.err (!%p3490_p6)
}
 0xc47   : > { %s3618_s23 = smov 128   ;;  %s3619_s9 = smov 8  }
 0xc48   : > { %2984 = dma.vmem_to_hbm [thread:$0]  (%p4656_p1), %s4461_s3, 512, %s4459_s10, %s2411_s14, %s3618_s23, %s3618_s23, %s3619_s9  }
 0xc49 PF: > { %s4657_s17 = sld [smem:[#allocation29_spill]]  ;;  %s4658_s13 = sld [smem:[#allocation22_spill]] }
 0xc4a   : > { %s4659_s19 = sld [smem:[#allocation37_spill]] }
 0xc4f   : > { %p3010_p7 = scmp.ge.s32.totalorder %s4657_s17, 2  ;;  %s2440_s16 = sand.u32 1, %s4658_s13  }
 0xc50   : > { %p4660_p4 = scmp.ne.s32.totalorder %s4659_s19, 0  ;;  %s2441_s4 = scalar_lea.sflag [#allocation5], %s2440_s16 }
 0xc52   : > { %p3006_p3 = pnand %p3010_p7, %p4660_p4 }
 0xc54   : > { %3555 = dma.done.wait (!%p3006_p3), %s2441_s4, 512  }
 0xc55   : > { %3557 = vsyncadd (!%p3006_p3), %s2441_s4, 4294966784  ;;  %s38_s18 = sadd.s32 1, %s4657_s17   ;;  %s4661_s25 = sld [smem:[#allocation20_spill]] }
 0xc56   : > { %p35_p12 = scmp.ge.s32.totalorder %s38_s18, 6   ;;  %s4662_s26 = sld [smem:[#allocation21_spill]] }
 0xc57   : > { %s4663_s27 = sld [smem:[#allocation35_spill]]  ;;  %s4664_s28 = sld [smem:[#allocation23_spill]] }
 0xc58   : > { %s4665_s29 = sld [smem:[#allocation24_spill]]  ;;  %s4666_s30 = sld [smem:[#allocation36_spill]] }
 0xc59   : > { %s4667_s14 = sld [smem:[#allocation27_spill]]  ;;  %s4668_s15 = sld [smem:[#allocation28_spill]] }
 0xc5a   : > { %s4669_s16 = sld [smem:[#allocation32_spill]]  ;;  %s4670_s17 = sld [smem:[#allocation33_spill]] }
 0xc5b   :  { %37 = sbr.rel (!%p35_p12) target bundleno = 30 (0x1e), region = 203 }
 0xc62   :  { %2446 = vsyncpa [#allocation4], 1 }
 0xc63   :  { %2448 = vsyncpa [#allocation4 + $0x1], 1 }
 0xc64   :  { %2449 = vsyncpa [#allocation7], 1 }
 0xc65   :  { %2451 = vsyncpa [#allocation7 + $0x1], 1 }
 0xc66   :  { %2452 = vsyncpa [#allocation10], 1 }
 0xc67   :  { %2454 = vsyncpa [#allocation10 + $0x1], 1 }
 0xc68   :  { %2455 = vsyncpa [#allocation13], 1 }
 0xc69   :  { %2457 = vsyncpa [#allocation13 + $0x1], 1 }
 0xc6a   :  { %2458 = vsyncpa [#allocation5], 1 }
 0xc6b   :  { %2460 = vsyncpa [#allocation5 + $0x1], 1 }

</bundles_post_ra>
